<compile_context>
chip_gen: v7x
topology: tpu7x:2x2x1
jax: 0.10.0
libtpu: 0.0.40
codegen_flags: <defaults>
</compile_context>

<pallas_src>
import jax
import jax.numpy as jnp
import numpy as np
from jax.experimental import pallas as pl
from jax.experimental.pallas import tpu as pltpu

# ---------------- synthetic stand-in for the pickled `vocab` -----------------
EMBEDDING = 32          # vocab['embedding']  (== LSTM hidden size)
E_MAX_LEN = 8           # vocab['e_max_len']
NUM_LAYERS = 2          # vocab['num_layers']  (kernel is written for 2 layers)
E_VOCAB = {'life': 1, '</s>': 2, 'the': 3, 'good': 4}           # vocab['e_vocab']
D_VOCAB = {'<s>': 1, '</s>': 2, 'life': 3, 'is': 4, 'good': 5}  # vocab['d_vocab']
D_VOCAB_INV = {v: k for k, v in D_VOCAB.items()}                # reversed d_vocab
SOS_ID = D_VOCAB['<s>']
EOS_ID = D_VOCAB['</s>']
MAX_DECODE_STEPS = 8    # cap for the data-dependent `while word != '</s>'` loop


# ------------------------------- fused kernel --------------------------------
def _seq2seq_kernel(
        # encoder input + lstm1 weights
        x_ref, wie0_ref, whe0_ref, be0_ref, wie1_ref, whe1_ref, be1_ref,
        # lstm2 weights
        wid0_ref, whd0_ref, bd0_ref, wid1_ref, whd1_ref, bd1_ref,
        # attention / linear weights
        w1_ref, b1_ref, emb2_ref, w2a_ref, w2b_ref, b2_ref, w3_ref, b3_ref,
        # initial decoder token id ('<s>') in SMEM
        d0_ref,
        # outputs
        tokens_ref, logits_first_ref, logits_last_ref,
        # scratch
        upo_scr):
    H = whe0_ref.shape[0]          # hidden / embedding size
    L = w1_ref.shape[0]            # e_max_len
    T = x_ref.shape[0]             # encoder length
    VDP = emb2_ref.shape[0]        # padded decoder-vocab rows

    def cell(gates, c):
        # PyTorch gate layout [i | f | g | o]
        i = jax.nn.sigmoid(gates[:, 0 * H:1 * H])
        f = jax.nn.sigmoid(gates[:, 1 * H:2 * H])
        g = jnp.tanh(gates[:, 2 * H:3 * H])
        o = jax.nn.sigmoid(gates[:, 3 * H:4 * H])
        c_new = f * c + i * g
        return o * jnp.tanh(c_new), c_new

    # ---------------- encoder (lstm1 over T steps) ----------------
    x = x_ref[...]                                                       # (T, H)
    # input->hidden gates for layer 0, all steps at once (one M=T matmul)
    xg0 = jnp.dot(x, wie0_ref[...], preferred_element_type=jnp.float32)  # (T, 4H)

    upo_scr[...] = jnp.zeros_like(upo_scr)                               # (L, H)
    zero = jnp.zeros((1, H), jnp.float32)
    he0, ce0, he1, ce1 = zero, zero, zero, zero
    for t in range(T):            # static unroll; only h @ W_hh left per step
        g0 = (xg0[t:t + 1, :]
              + jnp.dot(he0, whe0_ref[...], preferred_element_type=jnp.float32)
              + be0_ref[...])
        he0, ce0 = cell(g0, ce0)
        g1 = (jnp.dot(he0, wie1_ref[...], preferred_element_type=jnp.float32)
              + jnp.dot(he1, whe1_ref[...], preferred_element_type=jnp.float32)
              + be1_ref[...])
        he1, ce1 = cell(g1, ce1)
        upo_scr[t:t + 1, :] = he1
    upo = upo_scr[...]                                  # (L, H), zero rows T..L-1

    # ---- hoisted decode-loop invariants ----
    ones_h = jnp.ones((1, H), jnp.float32)
    # rowsum over H on the MXU: (attn[:,:,None]*upo).sum(2) == attn * rowsum(upo)
    upo_rowsum = jax.lax.dot_general(ones_h, upo, (((1,), (1,)), ((), ())),
                                     preferred_element_type=jnp.float32)  # (1, L)
    lane_iota = jax.lax.broadcasted_iota(jnp.int32, (1, 128), 1)
    vocab_iota = jax.lax.broadcasted_iota(jnp.int32, (1, VDP), 1)

    def decode_compute(hd0, cd0, hd1, cd1, tok):
        # attention scores over H on the MXU (no cross-lane reduce)
        scores = jax.lax.dot_general(hd1, upo, (((1,), (1,)), ((), ())),
                                     preferred_element_type=jnp.float32)   # (1, L)
        scores = (jnp.dot(scores, w1_ref[...], preferred_element_type=jnp.float32)
                  + b1_ref[...])                                            # lin1
        scores = scores - jnp.max(scores, axis=1, keepdims=True)
        p = jnp.exp(scores)
        attn = p * pl.reciprocal(jnp.sum(p, axis=1, keepdims=True), approx=True)
        ctx = attn * upo_rowsum                                             # (1, L)

        # emb2 lookup as a one-hot matmul (keeps the gather on the MXU)
        onehot = (vocab_iota == tok).astype(jnp.float32)                    # (1, VDP)
        de = jnp.dot(onehot, emb2_ref[...], preferred_element_type=jnp.float32)  # (1, H)

        # lin2 with weight split over [ctx | de] (avoids a lane concat)
        de2 = (jnp.dot(ctx, w2a_ref[...], preferred_element_type=jnp.float32)
               + jnp.dot(de, w2b_ref[...], preferred_element_type=jnp.float32)
               + b2_ref[...])                                               # (1, H)

        # lstm2: 2 layers, one time step
        g0 = (jnp.dot(de2, wid0_ref[...], preferred_element_type=jnp.float32)
              + jnp.dot(hd0, whd0_ref[...], preferred_element_type=jnp.float32)
              + bd0_ref[...])
        hd0n, cd0n = cell(g0, cd0)
        g1 = (jnp.dot(hd0n, wid1_ref[...], preferred_element_type=jnp.float32)
              + jnp.dot(hd1, whd1_ref[...], preferred_element_type=jnp.float32)
              + bd1_ref[...])
        hd1n, cd1n = cell(g1, cd1)

        # lin3, lane-dense padded to 128 (pad bias -1e30 keeps argmax honest)
        logits = (jnp.dot(hd1n, w3_ref[...], preferred_element_type=jnp.float32)
                  + b3_ref[...])                                            # (1, 128)
        # in-kernel argmax (+1, as in get_word)
        mx = jnp.max(logits, axis=1, keepdims=True)
        idx = jnp.min(jnp.where(logits >= mx, lane_iota, 128),
                      axis=1, keepdims=True)
        tok_new = idx + 1                                                   # (1, 1) int32
        return hd0n, cd0n, hd1n, cd1n, logits, tok_new

    # ---------------- greedy decode, entirely on device ----------------
    # TODO(synk): the PyTorch `while word != '</s>'` loop has data-dependent,
    # potentially unbounded termination; here it is a masked fori_loop capped
    # at MAX_DECODE_STEPS with early-exit semantics via the `done` flag.
    tok0 = jnp.full((1, 1), d0_ref[0], dtype=jnp.int32)
    # lstm2 starts from lstm1's final (last_hid, last_state)
    hd0, cd0, hd1, cd1 = he0, ce0, he1, ce1

    # peel step 0 (the PyTorch loop always runs at least once)
    hd0, cd0, hd1, cd1, logits0, tok_new = decode_compute(hd0, cd0, hd1, cd1, tok0)
    logits_first_ref[...] = logits0
    toks = jnp.where(lane_iota == 0, tok_new, jnp.zeros((1, 128), jnp.int32))
    flog = logits0
    tok = tok_new
    done = (tok_new == EOS_ID).astype(jnp.int32)                            # (1, 1)

    def body(step, carry):
        hd0, cd0, hd1, cd1, tok, done, toks, flog = carry
        active = done == 0                                                  # (1, 1) bool
        hd0n, cd0n, hd1n, cd1n, logits, tok_new = decode_compute(hd0, cd0, hd1, cd1, tok)
        toks = jnp.where(jnp.logical_and(lane_iota == step, active), tok_new, toks)
        flog = jnp.where(active, logits, flog)
        sel = lambda new, old: jnp.where(active, new, old)
        return (sel(hd0n, hd0), sel(cd0n, cd0), sel(hd1n, hd1), sel(cd1n, cd1),
                sel(tok_new, tok),
                jnp.maximum(done, (tok_new == EOS_ID).astype(jnp.int32)),
                toks, flog)

    carry = (hd0, cd0, hd1, cd1, tok, done, toks, flog)
    carry = jax.lax.fori_loop(1, MAX_DECODE_STEPS, body, carry)
    toks, flog = carry[6], carry[7]

    tokens_ref[...] = toks
    logits_last_ref[...] = flog


# ------------------------------ wrapper ---------------------------------------
def _prep(params):
    """Pad / split weights for the kernel (lane-dense lin3, split lin2)."""
    H, L, VD = EMBEDDING, E_MAX_LEN, len(D_VOCAB)
    emb2p = jnp.zeros((8, H), jnp.float32).at[:params['emb2'].shape[0]].set(params['emb2'])
    w3p = jnp.zeros((H, 128), jnp.float32).at[:, :VD].set(params['w3_t'])
    b3p = jnp.full((1, 128), -1e30, jnp.float32).at[:, :VD].set(params['b3'])
    return emb2p, params['w2_t'][:L], params['w2_t'][L:], w3p, b3p


@jax.jit
def attention_forward(e_tokens, d0, params):
    """Full fused forward: encoder + device-side greedy decode, ONE pallas_call."""
    H, L = EMBEDDING, E_MAX_LEN
    x_emb = jnp.take(params['emb1'], e_tokens[0], axis=0)        # (T, H) emb1 gather (glue)
    emb2p, w2a_t, w2b_t, w3p, b3p = _prep(params)
    (wie0, whe0, be0), (wie1, whe1, be1) = params['lstm1']
    (wid0, whd0, bd0), (wid1, whd1, bd1) = params['lstm2']

    vmem_specs = [pl.BlockSpec(memory_space=pltpu.MemorySpace.VMEM) for _ in range(21)]
    smem_spec = pl.BlockSpec(memory_space=pltpu.MemorySpace.SMEM)
    out_spec = pl.BlockSpec(memory_space=pltpu.MemorySpace.VMEM)

    return pl.pallas_call(
        _seq2seq_kernel,
        out_shape=(jax.ShapeDtypeStruct((1, 128), jnp.int32),    # greedy token ids
                   jax.ShapeDtypeStruct((1, 128), jnp.float32),  # logits, first step
                   jax.ShapeDtypeStruct((1, 128), jnp.float32)), # logits, last step
        in_specs=vmem_specs + [smem_spec],
        out_specs=(out_spec, out_spec, out_spec),
        scratch_shapes=[pltpu.VMEM((L, H), jnp.float32)],        # upo (padded enc outputs)
    )(x_emb,
      wie0, whe0, be0, wie1, whe1, be1,
      wid0, whd0, bd0, wid1, whd1, bd1,
      params['w1_t'], params['b1'], emb2p, w2a_t, w2b_t, params['b2'],
      w3p, b3p, d0.astype(jnp.int32))


# ------------------------------ params ----------------------------------------
def init_params(key):
    keys = iter(jax.random.split(key, 32))

    def nrm(shape, scale=0.1):
        return jax.random.normal(next(keys), shape, jnp.float32) * scale

    H, L = EMBEDDING, E_MAX_LEN

    def lstm_params():
        layers = []
        for _ in range(NUM_LAYERS):
            # stored pre-transposed: PyTorch weight_ih_l{k} is (4H, in) -> (in, 4H)
            layers.append((nrm((H, 4 * H)),      # weight_ih^T (input_size == H)
                           nrm((H, 4 * H)),      # weight_hh^T
                           nrm((1, 4 * H))))     # bias_ih + bias_hh combined
        return layers

    return dict(
        emb1=nrm((len(E_VOCAB) + 1, H), 1.0),
        emb2=nrm((len(D_VOCAB) + 1, H), 1.0).at[0].set(0.0),      # padding_idx=0
        lstm1=lstm_params(), lstm2=lstm_params(),
        w1_t=nrm((L, L)), b1=nrm((1, L)),                          # lin1 (L -> L)
        w2_t=nrm((L + H, H)), b2=nrm((1, H)),                      # lin2 (L+H -> H)
        w3_t=nrm((H, len(D_VOCAB))), b3=nrm((1, len(D_VOCAB))),    # lin3 (H -> |V_d|)
    )


# ------------------------- pure-JAX reference (for validation) ----------------
def reference_forward(e_tokens, d0_id, p):
    """Faithful mirror of the PyTorch Attention.forward greedy decode."""
    H, L = EMBEDDING, E_MAX_LEN
    hi = jax.lax.Precision.HIGHEST
    dot = lambda a, b: jnp.dot(a, b, precision=hi)

    def cell(x, h, c, wih_t, whh_t, b):
        g = dot(x, wih_t) + dot(h, whh_t) + b
        i = jax.nn.sigmoid(g[:, 0 * H:1 * H]); f = jax.nn.sigmoid(g[:, 1 * H:2 * H])
        gg = jnp.tanh(g[:, 2 * H:3 * H]); o = jax.nn.sigmoid(g[:, 3 * H:4 * H])
        c2 = f * c + i * gg
        return o * jnp.tanh(c2), c2

    T = e_tokens.shape[1]
    x = jnp.take(p['emb1'], e_tokens[0], axis=0)
    hs = [jnp.zeros((1, H), jnp.float32) for _ in range(NUM_LAYERS)]
    cs = [jnp.zeros((1, H), jnp.float32) for _ in range(NUM_LAYERS)]
    outs = []
    for t in range(T):
        inp = x[t:t + 1]
        for l in range(NUM_LAYERS):
            hs[l], cs[l] = cell(inp, hs[l], cs[l], *p['lstm1'][l])
            inp = hs[l]
        outs.append(inp)
    upo = jnp.concatenate(outs + [jnp.zeros((L - T, H), jnp.float32)], axis=0)[None]

    tok = int(d0_id)
    tokens, logits_first, logits = [], None, None
    for step in range(MAX_DECODE_STEPS):
        hid = hs[-1]                                            # (1, H)
        c = jnp.sum(hid[:, None, :] * upo, axis=2)              # (1, L)
        c = dot(c, p['w1_t']) + p['b1']
        c = jax.nn.softmax(c, axis=1)
        c = jnp.sum(c[:, :, None] * upo, axis=2)                # (1, L)  degenerate ctx (as in source)
        de = p['emb2'][tok][None]                               # (1, H)
        de = dot(jnp.concatenate([c, de], axis=1), p['w2_t']) + p['b2']
        inp = de
        for l in range(NUM_LAYERS):
            hs[l], cs[l] = cell(inp, hs[l], cs[l], *p['lstm2'][l])
            inp = hs[l]
        logits = dot(inp, p['w3_t']) + p['b3']                  # (1, |V_d|)
        if step == 0:
            logits_first = logits
        tok = int(jnp.argmax(logits[0])) + 1                    # get_word: argmax + 1
        tokens.append(tok)
        if tok == EOS_ID:
            break
    return tokens, logits_first, logits


# ------------------------------ main ------------------------------------------
if __name__ == "__main__":
    params = init_params(jax.random.PRNGKey(0))

    sentence = 'life </s>'
    e_tokens = jnp.array([[E_VOCAB[s] for s in sentence.split()]], dtype=jnp.int32)  # (1, 2)
    d0 = jnp.array([SOS_ID], dtype=jnp.int32)                                        # (1,)

    tokens, logits_first, logits_last = attention_forward(e_tokens, d0, params)
    tokens, logits_first, logits_last = jax.block_until_ready(
        (tokens, logits_first, logits_last))

    # Validate the first decode step against a faithful pure-JAX reference
    # (later steps follow discrete greedy choices, so they are covered via this).
    ref_tokens, ref_logits_first, _ = reference_forward(e_tokens, SOS_ID, params)
    np.testing.assert_allclose(np.asarray(logits_first[0, :len(D_VOCAB)]),
                               np.asarray(ref_logits_first[0]),
                               rtol=2e-2, atol=2e-2)

    # Decode the device-produced greedy token ids back to words (mirrors the
    # original per-step print(word) without host syncs during decoding).
    ids = np.asarray(tokens[0, :MAX_DECODE_STEPS]).tolist()
    words = []
    for t in ids:
        if t == 0:
            break
        words.append(D_VOCAB_INV[int(t)])
        if t == EOS_ID:
            break

    print("KERNEL_OK")
</pallas_src>

<mosaic_0001>
module attributes {stable_mosaic.version = 11 : i64} {
  func.func @_seq2seq_kernel(%arg0: memref<2x32xf32, #tpu.memory_space<vmem>>, %arg1: memref<32x128xf32, #tpu.memory_space<vmem>>, %arg2: memref<32x128xf32, #tpu.memory_space<vmem>>, %arg3: memref<1x128xf32, #tpu.memory_space<vmem>>, %arg4: memref<32x128xf32, #tpu.memory_space<vmem>>, %arg5: memref<32x128xf32, #tpu.memory_space<vmem>>, %arg6: memref<1x128xf32, #tpu.memory_space<vmem>>, %arg7: memref<32x128xf32, #tpu.memory_space<vmem>>, %arg8: memref<32x128xf32, #tpu.memory_space<vmem>>, %arg9: memref<1x128xf32, #tpu.memory_space<vmem>>, %arg10: memref<32x128xf32, #tpu.memory_space<vmem>>, %arg11: memref<32x128xf32, #tpu.memory_space<vmem>>, %arg12: memref<1x128xf32, #tpu.memory_space<vmem>>, %arg13: memref<8x8xf32, #tpu.memory_space<vmem>>, %arg14: memref<1x8xf32, #tpu.memory_space<vmem>>, %arg15: memref<8x32xf32, #tpu.memory_space<vmem>>, %arg16: memref<8x32xf32, #tpu.memory_space<vmem>>, %arg17: memref<32x32xf32, #tpu.memory_space<vmem>>, %arg18: memref<1x32xf32, #tpu.memory_space<vmem>>, %arg19: memref<32x128xf32, #tpu.memory_space<vmem>>, %arg20: memref<1x128xf32, #tpu.memory_space<vmem>>, %arg21: memref<1xi32, #tpu.memory_space<smem>>, %arg22: memref<1x128xi32, #tpu.memory_space<vmem>>, %arg23: memref<1x128xf32, #tpu.memory_space<vmem>>, %arg24: memref<1x128xf32, #tpu.memory_space<vmem>>, %arg25: memref<8x32xf32, #tpu.memory_space<vmem>>) attributes {dimension_semantics = [], scalar_prefetch = 0 : i64, scratch_operands = 1 : i64, tpu.core_type = #tpu.core_type<tc>} {
    %c0 = arith.constant 0 : index
    %c0_0 = arith.constant 0 : index
    %0 = vector.load %arg0[%c0, %c0_0] : memref<2x32xf32, #tpu.memory_space<vmem>>, vector<2x32xf32>
    %c0_1 = arith.constant 0 : index
    %c0_2 = arith.constant 0 : index
    %1 = vector.load %arg1[%c0_1, %c0_2] : memref<32x128xf32, #tpu.memory_space<vmem>>, vector<32x128xf32>
    %cst = arith.constant dense<0.000000e+00> : vector<2x128xf32>
    %2 = tpu.matmul %0, %1, %cst {dimension_numbers = #tpu.dot_dimension_numbers<[1], [0], [0], [1], [0, 0, 1, 1], [], []>} : vector<2x32xf32>, vector<32x128xf32>, vector<2x128xf32> -> vector<2x128xf32>
    %cst_3 = arith.constant 0.000000e+00 : f32
    %3 = vector.broadcast %cst_3 : f32 to vector<8x32xf32>
    %c0_4 = arith.constant 0 : index
    %c0_5 = arith.constant 0 : index
    %4 = vector.load %arg25[%c0_4, %c0_5] : memref<8x32xf32, #tpu.memory_space<vmem>>, vector<8x32xf32>
    tpu.vector_store %arg25[%c0_4, %c0_5], %3 {strides = array<i32>} : memref<8x32xf32, #tpu.memory_space<vmem>>, vector<8x32xf32>,
    %cst_6 = arith.constant 0.000000e+00 : f32
    %5 = vector.broadcast %cst_6 : f32 to vector<1x32xf32>
    %6 = vector.extract_strided_slice %2 {offsets = [0, 0], sizes = [1, 128], strides = [1, 1]} : vector<2x128xf32> to vector<1x128xf32>
    %c0_7 = arith.constant 0 : index
    %c0_8 = arith.constant 0 : index
    %7 = vector.load %arg2[%c0_7, %c0_8] : memref<32x128xf32, #tpu.memory_space<vmem>>, vector<32x128xf32>
    %cst_9 = arith.constant dense<0.000000e+00> : vector<1x128xf32>
    %8 = tpu.matmul %5, %7, %cst_9 {dimension_numbers = #tpu.dot_dimension_numbers<[1], [0], [0], [1], [0, 0, 1, 1], [], []>} : vector<1x32xf32>, vector<32x128xf32>, vector<1x128xf32> -> vector<1x128xf32>
    %9 = arith.addf %6, %8 : vector<1x128xf32>
    %c0_10 = arith.constant 0 : index
    %c0_11 = arith.constant 0 : index
    %10 = vector.load %arg3[%c0_10, %c0_11] : memref<1x128xf32, #tpu.memory_space<vmem>>, vector<1x128xf32>
    %11 = arith.addf %9, %10 : vector<1x128xf32>
    %12 = vector.extract_strided_slice %11 {offsets = [0, 0], sizes = [1, 32], strides = [1, 1]} : vector<1x128xf32> to vector<1x32xf32>
    %13 = arith.negf %12 : vector<1x32xf32>
    %14 = math.exp %13 : vector<1x32xf32>
    %cst_12 = arith.constant 1.000000e+00 : f32
    %15 = vector.broadcast %cst_12 : f32 to vector<1x32xf32>
    %16 = arith.addf %15, %14 : vector<1x32xf32>
    %17 = arith.divf %15, %16 : vector<1x32xf32>
    %18 = vector.extract_strided_slice %11 {offsets = [0, 32], sizes = [1, 32], strides = [1, 1]} : vector<1x128xf32> to vector<1x32xf32>
    %19 = arith.negf %18 : vector<1x32xf32>
    %20 = math.exp %19 : vector<1x32xf32>
    %cst_13 = arith.constant 1.000000e+00 : f32
    %21 = vector.broadcast %cst_13 : f32 to vector<1x32xf32>
    %22 = arith.addf %21, %20 : vector<1x32xf32>
    %23 = arith.divf %21, %22 : vector<1x32xf32>
    %24 = vector.extract_strided_slice %11 {offsets = [0, 64], sizes = [1, 32], strides = [1, 1]} : vector<1x128xf32> to vector<1x32xf32>
    %25 = math.tanh %24 : vector<1x32xf32>
    %26 = vector.extract_strided_slice %11 {offsets = [0, 96], sizes = [1, 32], strides = [1, 1]} : vector<1x128xf32> to vector<1x32xf32>
    %27 = arith.negf %26 : vector<1x32xf32>
    %28 = math.exp %27 : vector<1x32xf32>
    %cst_14 = arith.constant 1.000000e+00 : f32
    %29 = vector.broadcast %cst_14 : f32 to vector<1x32xf32>
    %30 = arith.addf %29, %28 : vector<1x32xf32>
    %31 = arith.divf %29, %30 : vector<1x32xf32>
    %32 = arith.mulf %23, %5 : vector<1x32xf32>
    %33 = arith.mulf %17, %25 : vector<1x32xf32>
    %34 = arith.addf %32, %33 : vector<1x32xf32>
    %35 = math.tanh %34 : vector<1x32xf32>
    %36 = arith.mulf %31, %35 : vector<1x32xf32>
    %c0_15 = arith.constant 0 : index
    %c0_16 = arith.constant 0 : index
    %37 = vector.load %arg4[%c0_15, %c0_16] : memref<32x128xf32, #tpu.memory_space<vmem>>, vector<32x128xf32>
    %cst_17 = arith.constant dense<0.000000e+00> : vector<1x128xf32>
    %38 = tpu.matmul %36, %37, %cst_17 {dimension_numbers = #tpu.dot_dimension_numbers<[1], [0], [0], [1], [0, 0, 1, 1], [], []>} : vector<1x32xf32>, vector<32x128xf32>, vector<1x128xf32> -> vector<1x128xf32>
    %c0_18 = arith.constant 0 : index
    %c0_19 = arith.constant 0 : index
    %39 = vector.load %arg5[%c0_18, %c0_19] : memref<32x128xf32, #tpu.memory_space<vmem>>, vector<32x128xf32>
    %cst_20 = arith.constant dense<0.000000e+00> : vector<1x128xf32>
    %40 = tpu.matmul %5, %39, %cst_20 {dimension_numbers = #tpu.dot_dimension_numbers<[1], [0], [0], [1], [0, 0, 1, 1], [], []>} : vector<1x32xf32>, vector<32x128xf32>, vector<1x128xf32> -> vector<1x128xf32>
    %41 = arith.addf %38, %40 : vector<1x128xf32>
    %c0_21 = arith.constant 0 : index
    %c0_22 = arith.constant 0 : index
    %42 = vector.load %arg6[%c0_21, %c0_22] : memref<1x128xf32, #tpu.memory_space<vmem>>, vector<1x128xf32>
    %43 = arith.addf %41, %42 : vector<1x128xf32>
    %44 = vector.extract_strided_slice %43 {offsets = [0, 0], sizes = [1, 32], strides = [1, 1]} : vector<1x128xf32> to vector<1x32xf32>
    %45 = arith.negf %44 : vector<1x32xf32>
    %46 = math.exp %45 : vector<1x32xf32>
    %cst_23 = arith.constant 1.000000e+00 : f32
    %47 = vector.broadcast %cst_23 : f32 to vector<1x32xf32>
    %48 = arith.addf %47, %46 : vector<1x32xf32>
    %49 = arith.divf %47, %48 : vector<1x32xf32>
    %50 = vector.extract_strided_slice %43 {offsets = [0, 32], sizes = [1, 32], strides = [1, 1]} : vector<1x128xf32> to vector<1x32xf32>
    %51 = arith.negf %50 : vector<1x32xf32>
    %52 = math.exp %51 : vector<1x32xf32>
    %cst_24 = arith.constant 1.000000e+00 : f32
    %53 = vector.broadcast %cst_24 : f32 to vector<1x32xf32>
    %54 = arith.addf %53, %52 : vector<1x32xf32>
    %55 = arith.divf %53, %54 : vector<1x32xf32>
    %56 = vector.extract_strided_slice %43 {offsets = [0, 64], sizes = [1, 32], strides = [1, 1]} : vector<1x128xf32> to vector<1x32xf32>
    %57 = math.tanh %56 : vector<1x32xf32>
    %58 = vector.extract_strided_slice %43 {offsets = [0, 96], sizes = [1, 32], strides = [1, 1]} : vector<1x128xf32> to vector<1x32xf32>
    %59 = arith.negf %58 : vector<1x32xf32>
    %60 = math.exp %59 : vector<1x32xf32>
    %cst_25 = arith.constant 1.000000e+00 : f32
    %61 = vector.broadcast %cst_25 : f32 to vector<1x32xf32>
    %62 = arith.addf %61, %60 : vector<1x32xf32>
    %63 = arith.divf %61, %62 : vector<1x32xf32>
    %64 = arith.mulf %55, %5 : vector<1x32xf32>
    %65 = arith.mulf %49, %57 : vector<1x32xf32>
    %66 = arith.addf %64, %65 : vector<1x32xf32>
    %67 = math.tanh %66 : vector<1x32xf32>
    %68 = arith.mulf %63, %67 : vector<1x32xf32>
    %c0_26 = arith.constant 0 : index
    %c0_27 = arith.constant 0 : index
    %69 = vector.load %arg25[%c0_26, %c0_27] : memref<8x32xf32, #tpu.memory_space<vmem>>, vector<1x32xf32>
    tpu.vector_store %arg25[%c0_26, %c0_27], %68 {strides = array<i32>} : memref<8x32xf32, #tpu.memory_space<vmem>>, vector<1x32xf32>,
    %70 = vector.extract_strided_slice %2 {offsets = [1, 0], sizes = [1, 128], strides = [1, 1]} : vector<2x128xf32> to vector<1x128xf32>
    %c0_28 = arith.constant 0 : index
    %c0_29 = arith.constant 0 : index
    %71 = vector.load %arg2[%c0_28, %c0_29] : memref<32x128xf32, #tpu.memory_space<vmem>>, vector<32x128xf32>
    %cst_30 = arith.constant dense<0.000000e+00> : vector<1x128xf32>
    %72 = tpu.matmul %36, %71, %cst_30 {dimension_numbers = #tpu.dot_dimension_numbers<[1], [0], [0], [1], [0, 0, 1, 1], [], []>} : vector<1x32xf32>, vector<32x128xf32>, vector<1x128xf32> -> vector<1x128xf32>
    %73 = arith.addf %70, %72 : vector<1x128xf32>
    %c0_31 = arith.constant 0 : index
    %c0_32 = arith.constant 0 : index
    %74 = vector.load %arg3[%c0_31, %c0_32] : memref<1x128xf32, #tpu.memory_space<vmem>>, vector<1x128xf32>
    %75 = arith.addf %73, %74 : vector<1x128xf32>
    %76 = vector.extract_strided_slice %75 {offsets = [0, 0], sizes = [1, 32], strides = [1, 1]} : vector<1x128xf32> to vector<1x32xf32>
    %77 = arith.negf %76 : vector<1x32xf32>
    %78 = math.exp %77 : vector<1x32xf32>
    %cst_33 = arith.constant 1.000000e+00 : f32
    %79 = vector.broadcast %cst_33 : f32 to vector<1x32xf32>
    %80 = arith.addf %79, %78 : vector<1x32xf32>
    %81 = arith.divf %79, %80 : vector<1x32xf32>
    %82 = vector.extract_strided_slice %75 {offsets = [0, 32], sizes = [1, 32], strides = [1, 1]} : vector<1x128xf32> to vector<1x32xf32>
    %83 = arith.negf %82 : vector<1x32xf32>
    %84 = math.exp %83 : vector<1x32xf32>
    %cst_34 = arith.constant 1.000000e+00 : f32
    %85 = vector.broadcast %cst_34 : f32 to vector<1x32xf32>
    %86 = arith.addf %85, %84 : vector<1x32xf32>
    %87 = arith.divf %85, %86 : vector<1x32xf32>
    %88 = vector.extract_strided_slice %75 {offsets = [0, 64], sizes = [1, 32], strides = [1, 1]} : vector<1x128xf32> to vector<1x32xf32>
    %89 = math.tanh %88 : vector<1x32xf32>
    %90 = vector.extract_strided_slice %75 {offsets = [0, 96], sizes = [1, 32], strides = [1, 1]} : vector<1x128xf32> to vector<1x32xf32>
    %91 = arith.negf %90 : vector<1x32xf32>
    %92 = math.exp %91 : vector<1x32xf32>
    %cst_35 = arith.constant 1.000000e+00 : f32
    %93 = vector.broadcast %cst_35 : f32 to vector<1x32xf32>
    %94 = arith.addf %93, %92 : vector<1x32xf32>
    %95 = arith.divf %93, %94 : vector<1x32xf32>
    %96 = arith.mulf %87, %34 : vector<1x32xf32>
    %97 = arith.mulf %81, %89 : vector<1x32xf32>
    %98 = arith.addf %96, %97 : vector<1x32xf32>
    %99 = math.tanh %98 : vector<1x32xf32>
    %100 = arith.mulf %95, %99 : vector<1x32xf32>
    %c0_36 = arith.constant 0 : index
    %c0_37 = arith.constant 0 : index
    %101 = vector.load %arg4[%c0_36, %c0_37] : memref<32x128xf32, #tpu.memory_space<vmem>>, vector<32x128xf32>
    %cst_38 = arith.constant dense<0.000000e+00> : vector<1x128xf32>
    %102 = tpu.matmul %100, %101, %cst_38 {dimension_numbers = #tpu.dot_dimension_numbers<[1], [0], [0], [1], [0, 0, 1, 1], [], []>} : vector<1x32xf32>, vector<32x128xf32>, vector<1x128xf32> -> vector<1x128xf32>
    %c0_39 = arith.constant 0 : index
    %c0_40 = arith.constant 0 : index
    %103 = vector.load %arg5[%c0_39, %c0_40] : memref<32x128xf32, #tpu.memory_space<vmem>>, vector<32x128xf32>
    %cst_41 = arith.constant dense<0.000000e+00> : vector<1x128xf32>
    %104 = tpu.matmul %68, %103, %cst_41 {dimension_numbers = #tpu.dot_dimension_numbers<[1], [0], [0], [1], [0, 0, 1, 1], [], []>} : vector<1x32xf32>, vector<32x128xf32>, vector<1x128xf32> -> vector<1x128xf32>
    %105 = arith.addf %102, %104 : vector<1x128xf32>
    %c0_42 = arith.constant 0 : index
    %c0_43 = arith.constant 0 : index
    %106 = vector.load %arg6[%c0_42, %c0_43] : memref<1x128xf32, #tpu.memory_space<vmem>>, vector<1x128xf32>
    %107 = arith.addf %105, %106 : vector<1x128xf32>
    %108 = vector.extract_strided_slice %107 {offsets = [0, 0], sizes = [1, 32], strides = [1, 1]} : vector<1x128xf32> to vector<1x32xf32>
    %109 = arith.negf %108 : vector<1x32xf32>
    %110 = math.exp %109 : vector<1x32xf32>
    %cst_44 = arith.constant 1.000000e+00 : f32
    %111 = vector.broadcast %cst_44 : f32 to vector<1x32xf32>
    %112 = arith.addf %111, %110 : vector<1x32xf32>
    %113 = arith.divf %111, %112 : vector<1x32xf32>
    %114 = vector.extract_strided_slice %107 {offsets = [0, 32], sizes = [1, 32], strides = [1, 1]} : vector<1x128xf32> to vector<1x32xf32>
    %115 = arith.negf %114 : vector<1x32xf32>
    %116 = math.exp %115 : vector<1x32xf32>
    %cst_45 = arith.constant 1.000000e+00 : f32
    %117 = vector.broadcast %cst_45 : f32 to vector<1x32xf32>
    %118 = arith.addf %117, %116 : vector<1x32xf32>
    %119 = arith.divf %117, %118 : vector<1x32xf32>
    %120 = vector.extract_strided_slice %107 {offsets = [0, 64], sizes = [1, 32], strides = [1, 1]} : vector<1x128xf32> to vector<1x32xf32>
    %121 = math.tanh %120 : vector<1x32xf32>
    %122 = vector.extract_strided_slice %107 {offsets = [0, 96], sizes = [1, 32], strides = [1, 1]} : vector<1x128xf32> to vector<1x32xf32>
    %123 = arith.negf %122 : vector<1x32xf32>
    %124 = math.exp %123 : vector<1x32xf32>
    %cst_46 = arith.constant 1.000000e+00 : f32
    %125 = vector.broadcast %cst_46 : f32 to vector<1x32xf32>
    %126 = arith.addf %125, %124 : vector<1x32xf32>
    %127 = arith.divf %125, %126 : vector<1x32xf32>
    %128 = arith.mulf %119, %66 : vector<1x32xf32>
    %129 = arith.mulf %113, %121 : vector<1x32xf32>
    %130 = arith.addf %128, %129 : vector<1x32xf32>
    %131 = math.tanh %130 : vector<1x32xf32>
    %132 = arith.mulf %127, %131 : vector<1x32xf32>
    %c1 = arith.constant 1 : index
    %c0_47 = arith.constant 0 : index
    %133 = vector.load %arg25[%c1, %c0_47] : memref<8x32xf32, #tpu.memory_space<vmem>>, vector<1x32xf32>
    tpu.vector_store %arg25[%c1, %c0_47], %132 {strides = array<i32>} : memref<8x32xf32, #tpu.memory_space<vmem>>, vector<1x32xf32>,
    %c0_48 = arith.constant 0 : index
    %c0_49 = arith.constant 0 : index
    %134 = vector.load %arg25[%c0_48, %c0_49] : memref<8x32xf32, #tpu.memory_space<vmem>>, vector<8x32xf32>
    %cst_50 = arith.constant 1.000000e+00 : f32
    %135 = vector.broadcast %cst_50 : f32 to vector<1x32xf32>
    %cst_51 = arith.constant dense<0.000000e+00> : vector<1x8xf32>
    %136 = tpu.matmul %135, %134, %cst_51 {dimension_numbers = #tpu.dot_dimension_numbers<[1], [1], [0], [0], [0, 0, 1, 0], [], []>} : vector<1x32xf32>, vector<8x32xf32>, vector<1x8xf32> -> vector<1x8xf32>
    %137 = tpu.iota {dimensions = array<i32: 1>} : vector<1x128xi32>
    %138 = tpu.iota {dimensions = array<i32: 1>} : vector<1x8xi32>
    %c0_52 = arith.constant 0 : index
    %139 = memref.load %arg21[%c0_52] : memref<1xi32, #tpu.memory_space<smem>>
    %140 = vector.broadcast %139 : i32 to vector<1x1xi32>
    %cst_53 = arith.constant dense<0.000000e+00> : vector<1x8xf32>
    %141 = tpu.matmul %132, %134, %cst_53 {dimension_numbers = #tpu.dot_dimension_numbers<[1], [1], [0], [0], [0, 0, 1, 0], [], []>} : vector<1x32xf32>, vector<8x32xf32>, vector<1x8xf32> -> vector<1x8xf32>
    %c0_54 = arith.constant 0 : index
    %c0_55 = arith.constant 0 : index
    %142 = vector.load %arg13[%c0_54, %c0_55] : memref<8x8xf32, #tpu.memory_space<vmem>>, vector<8x8xf32>
    %cst_56 = arith.constant dense<0.000000e+00> : vector<1x8xf32>
    %143 = tpu.matmul %141, %142, %cst_56 {dimension_numbers = #tpu.dot_dimension_numbers<[1], [0], [0], [1], [0, 0, 1, 1], [], []>} : vector<1x8xf32>, vector<8x8xf32>, vector<1x8xf32> -> vector<1x8xf32>
    %c0_57 = arith.constant 0 : index
    %c0_58 = arith.constant 0 : index
    %144 = vector.load %arg14[%c0_57, %c0_58] : memref<1x8xf32, #tpu.memory_space<vmem>>, vector<1x8xf32>
    %145 = arith.addf %143, %144 : vector<1x8xf32>
    %cst_59 = arith.constant dense<0xFF800000> : vector<1xf32>
    %146 = vector.multi_reduction <maximumf>, %145, %cst_59 [1] : vector<1x8xf32> to vector<1xf32>
    %147 = vector.shape_cast %146 : vector<1xf32> to vector<1x1xf32>
    %148 = vector.broadcast %147 : vector<1x1xf32> to vector<1x8xf32>
    %149 = arith.subf %145, %148 : vector<1x8xf32>
    %150 = math.exp %149 : vector<1x8xf32>
    %cst_60 = arith.constant dense<0.000000e+00> : vector<1xf32>
    %151 = vector.multi_reduction <add>, %150, %cst_60 [1] : vector<1x8xf32> to vector<1xf32>
    %152 = vector.shape_cast %151 : vector<1xf32> to vector<1x1xf32>
    %153 = tpu.reciprocal %152 {approx = true} : vector<1x1xf32> -> vector<1x1xf32>
    %154 = vector.broadcast %153 : vector<1x1xf32> to vector<1x8xf32>
    %155 = arith.mulf %150, %154 : vector<1x8xf32>
    %156 = arith.mulf %155, %136 : vector<1x8xf32>
    %157 = vector.broadcast %140 : vector<1x1xi32> to vector<1x8xi32>
    %158 = arith.cmpi eq, %138, %157 : vector<1x8xi32>
    %159 = arith.extui %158 : vector<1x8xi1> to vector<1x8xi32>
    %160 = arith.sitofp %159 : vector<1x8xi32> to vector<1x8xf32>
    %c0_61 = arith.constant 0 : index
    %c0_62 = arith.constant 0 : index
    %161 = vector.load %arg15[%c0_61, %c0_62] : memref<8x32xf32, #tpu.memory_space<vmem>>, vector<8x32xf32>
    %cst_63 = arith.constant dense<0.000000e+00> : vector<1x32xf32>
    %162 = tpu.matmul %160, %161, %cst_63 {dimension_numbers = #tpu.dot_dimension_numbers<[1], [0], [0], [1], [0, 0, 1, 1], [], []>} : vector<1x8xf32>, vector<8x32xf32>, vector<1x32xf32> -> vector<1x32xf32>
    %c0_64 = arith.constant 0 : index
    %c0_65 = arith.constant 0 : index
    %163 = vector.load %arg16[%c0_64, %c0_65] : memref<8x32xf32, #tpu.memory_space<vmem>>, vector<8x32xf32>
    %cst_66 = arith.constant dense<0.000000e+00> : vector<1x32xf32>
    %164 = tpu.matmul %156, %163, %cst_66 {dimension_numbers = #tpu.dot_dimension_numbers<[1], [0], [0], [1], [0, 0, 1, 1], [], []>} : vector<1x8xf32>, vector<8x32xf32>, vector<1x32xf32> -> vector<1x32xf32>
    %c0_67 = arith.constant 0 : index
    %c0_68 = arith.constant 0 : index
    %165 = vector.load %arg17[%c0_67, %c0_68] : memref<32x32xf32, #tpu.memory_space<vmem>>, vector<32x32xf32>
    %cst_69 = arith.constant dense<0.000000e+00> : vector<1x32xf32>
    %166 = tpu.matmul %162, %165, %cst_69 {dimension_numbers = #tpu.dot_dimension_numbers<[1], [0], [0], [1], [0, 0, 1, 1], [], []>} : vector<1x32xf32>, vector<32x32xf32>, vector<1x32xf32> -> vector<1x32xf32>
    %167 = arith.addf %164, %166 : vector<1x32xf32>
    %c0_70 = arith.constant 0 : index
    %c0_71 = arith.constant 0 : index
    %168 = vector.load %arg18[%c0_70, %c0_71] : memref<1x32xf32, #tpu.memory_space<vmem>>, vector<1x32xf32>
    %169 = arith.addf %167, %168 : vector<1x32xf32>
    %c0_72 = arith.constant 0 : index
    %c0_73 = arith.constant 0 : index
    %170 = vector.load %arg7[%c0_72, %c0_73] : memref<32x128xf32, #tpu.memory_space<vmem>>, vector<32x128xf32>
    %cst_74 = arith.constant dense<0.000000e+00> : vector<1x128xf32>
    %171 = tpu.matmul %169, %170, %cst_74 {dimension_numbers = #tpu.dot_dimension_numbers<[1], [0], [0], [1], [0, 0, 1, 1], [], []>} : vector<1x32xf32>, vector<32x128xf32>, vector<1x128xf32> -> vector<1x128xf32>
    %c0_75 = arith.constant 0 : index
    %c0_76 = arith.constant 0 : index
    %172 = vector.load %arg8[%c0_75, %c0_76] : memref<32x128xf32, #tpu.memory_space<vmem>>, vector<32x128xf32>
    %cst_77 = arith.constant dense<0.000000e+00> : vector<1x128xf32>
    %173 = tpu.matmul %100, %172, %cst_77 {dimension_numbers = #tpu.dot_dimension_numbers<[1], [0], [0], [1], [0, 0, 1, 1], [], []>} : vector<1x32xf32>, vector<32x128xf32>, vector<1x128xf32> -> vector<1x128xf32>
    %174 = arith.addf %171, %173 : vector<1x128xf32>
    %c0_78 = arith.constant 0 : index
    %c0_79 = arith.constant 0 : index
    %175 = vector.load %arg9[%c0_78, %c0_79] : memref<1x128xf32, #tpu.memory_space<vmem>>, vector<1x128xf32>
    %176 = arith.addf %174, %175 : vector<1x128xf32>
    %177 = vector.extract_strided_slice %176 {offsets = [0, 0], sizes = [1, 32], strides = [1, 1]} : vector<1x128xf32> to vector<1x32xf32>
    %178 = arith.negf %177 : vector<1x32xf32>
    %179 = math.exp %178 : vector<1x32xf32>
    %cst_80 = arith.constant 1.000000e+00 : f32
    %180 = vector.broadcast %cst_80 : f32 to vector<1x32xf32>
    %181 = arith.addf %180, %179 : vector<1x32xf32>
    %182 = arith.divf %180, %181 : vector<1x32xf32>
    %183 = vector.extract_strided_slice %176 {offsets = [0, 32], sizes = [1, 32], strides = [1, 1]} : vector<1x128xf32> to vector<1x32xf32>
    %184 = arith.negf %183 : vector<1x32xf32>
    %185 = math.exp %184 : vector<1x32xf32>
    %cst_81 = arith.constant 1.000000e+00 : f32
    %186 = vector.broadcast %cst_81 : f32 to vector<1x32xf32>
    %187 = arith.addf %186, %185 : vector<1x32xf32>
    %188 = arith.divf %186, %187 : vector<1x32xf32>
    %189 = vector.extract_strided_slice %176 {offsets = [0, 64], sizes = [1, 32], strides = [1, 1]} : vector<1x128xf32> to vector<1x32xf32>
    %190 = math.tanh %189 : vector<1x32xf32>
    %191 = vector.extract_strided_slice %176 {offsets = [0, 96], sizes = [1, 32], strides = [1, 1]} : vector<1x128xf32> to vector<1x32xf32>
    %192 = arith.negf %191 : vector<1x32xf32>
    %193 = math.exp %192 : vector<1x32xf32>
    %cst_82 = arith.constant 1.000000e+00 : f32
    %194 = vector.broadcast %cst_82 : f32 to vector<1x32xf32>
    %195 = arith.addf %194, %193 : vector<1x32xf32>
    %196 = arith.divf %194, %195 : vector<1x32xf32>
    %197 = arith.mulf %188, %98 : vector<1x32xf32>
    %198 = arith.mulf %182, %190 : vector<1x32xf32>
    %199 = arith.addf %197, %198 : vector<1x32xf32>
    %200 = math.tanh %199 : vector<1x32xf32>
    %201 = arith.mulf %196, %200 : vector<1x32xf32>
    %c0_83 = arith.constant 0 : index
    %c0_84 = arith.constant 0 : index
    %202 = vector.load %arg10[%c0_83, %c0_84] : memref<32x128xf32, #tpu.memory_space<vmem>>, vector<32x128xf32>
    %cst_85 = arith.constant dense<0.000000e+00> : vector<1x128xf32>
    %203 = tpu.matmul %201, %202, %cst_85 {dimension_numbers = #tpu.dot_dimension_numbers<[1], [0], [0], [1], [0, 0, 1, 1], [], []>} : vector<1x32xf32>, vector<32x128xf32>, vector<1x128xf32> -> vector<1x128xf32>
    %c0_86 = arith.constant 0 : index
    %c0_87 = arith.constant 0 : index
    %204 = vector.load %arg11[%c0_86, %c0_87] : memref<32x128xf32, #tpu.memory_space<vmem>>, vector<32x128xf32>
    %cst_88 = arith.constant dense<0.000000e+00> : vector<1x128xf32>
    %205 = tpu.matmul %132, %204, %cst_88 {dimension_numbers = #tpu.dot_dimension_numbers<[1], [0], [0], [1], [0, 0, 1, 1], [], []>} : vector<1x32xf32>, vector<32x128xf32>, vector<1x128xf32> -> vector<1x128xf32>
    %206 = arith.addf %203, %205 : vector<1x128xf32>
    %c0_89 = arith.constant 0 : index
    %c0_90 = arith.constant 0 : index
    %207 = vector.load %arg12[%c0_89, %c0_90] : memref<1x128xf32, #tpu.memory_space<vmem>>, vector<1x128xf32>
    %208 = arith.addf %206, %207 : vector<1x128xf32>
    %209 = vector.extract_strided_slice %208 {offsets = [0, 0], sizes = [1, 32], strides = [1, 1]} : vector<1x128xf32> to vector<1x32xf32>
    %210 = arith.negf %209 : vector<1x32xf32>
    %211 = math.exp %210 : vector<1x32xf32>
    %cst_91 = arith.constant 1.000000e+00 : f32
    %212 = vector.broadcast %cst_91 : f32 to vector<1x32xf32>
    %213 = arith.addf %212, %211 : vector<1x32xf32>
    %214 = arith.divf %212, %213 : vector<1x32xf32>
    %215 = vector.extract_strided_slice %208 {offsets = [0, 32], sizes = [1, 32], strides = [1, 1]} : vector<1x128xf32> to vector<1x32xf32>
    %216 = arith.negf %215 : vector<1x32xf32>
    %217 = math.exp %216 : vector<1x32xf32>
    %cst_92 = arith.constant 1.000000e+00 : f32
    %218 = vector.broadcast %cst_92 : f32 to vector<1x32xf32>
    %219 = arith.addf %218, %217 : vector<1x32xf32>
    %220 = arith.divf %218, %219 : vector<1x32xf32>
    %221 = vector.extract_strided_slice %208 {offsets = [0, 64], sizes = [1, 32], strides = [1, 1]} : vector<1x128xf32> to vector<1x32xf32>
    %222 = math.tanh %221 : vector<1x32xf32>
    %223 = vector.extract_strided_slice %208 {offsets = [0, 96], sizes = [1, 32], strides = [1, 1]} : vector<1x128xf32> to vector<1x32xf32>
    %224 = arith.negf %223 : vector<1x32xf32>
    %225 = math.exp %224 : vector<1x32xf32>
    %cst_93 = arith.constant 1.000000e+00 : f32
    %226 = vector.broadcast %cst_93 : f32 to vector<1x32xf32>
    %227 = arith.addf %226, %225 : vector<1x32xf32>
    %228 = arith.divf %226, %227 : vector<1x32xf32>
    %229 = arith.mulf %220, %130 : vector<1x32xf32>
    %230 = arith.mulf %214, %222 : vector<1x32xf32>
    %231 = arith.addf %229, %230 : vector<1x32xf32>
    %232 = math.tanh %231 : vector<1x32xf32>
    %233 = arith.mulf %228, %232 : vector<1x32xf32>
    %c0_94 = arith.constant 0 : index
    %c0_95 = arith.constant 0 : index
    %234 = vector.load %arg19[%c0_94, %c0_95] : memref<32x128xf32, #tpu.memory_space<vmem>>, vector<32x128xf32>
    %cst_96 = arith.constant dense<0.000000e+00> : vector<1x128xf32>
    %235 = tpu.matmul %233, %234, %cst_96 {dimension_numbers = #tpu.dot_dimension_numbers<[1], [0], [0], [1], [0, 0, 1, 1], [], []>} : vector<1x32xf32>, vector<32x128xf32>, vector<1x128xf32> -> vector<1x128xf32>
    %c0_97 = arith.constant 0 : index
    %c0_98 = arith.constant 0 : index
    %236 = vector.load %arg20[%c0_97, %c0_98] : memref<1x128xf32, #tpu.memory_space<vmem>>, vector<1x128xf32>
    %237 = arith.addf %235, %236 : vector<1x128xf32>
    %cst_99 = arith.constant dense<0xFF800000> : vector<1xf32>
    %238 = vector.multi_reduction <maximumf>, %237, %cst_99 [1] : vector<1x128xf32> to vector<1xf32>
    %239 = vector.shape_cast %238 : vector<1xf32> to vector<1x1xf32>
    %240 = vector.broadcast %239 : vector<1x1xf32> to vector<1x128xf32>
    %241 = arith.cmpf oge, %237, %240 : vector<1x128xf32>
    %c128_i32 = arith.constant 128 : i32
    %242 = vector.broadcast %c128_i32 : i32 to vector<1x128xi32>
    %243 = arith.select %241, %137, %242 : vector<1x128xi1>, vector<1x128xi32>
    %cst_100 = arith.constant dense<2147483647> : vector<1xi32>
    %244 = vector.multi_reduction <minsi>, %243, %cst_100 [1] : vector<1x128xi32> to vector<1xi32>
    %245 = vector.shape_cast %244 : vector<1xi32> to vector<1x1xi32>
    %c1_i32 = arith.constant 1 : i32
    %246 = vector.broadcast %c1_i32 : i32 to vector<1x1xi32>
    %247 = arith.addi %245, %246 : vector<1x1xi32>
    %c0_101 = arith.constant 0 : index
    %c0_102 = arith.constant 0 : index
    %248 = vector.load %arg23[%c0_101, %c0_102] : memref<1x128xf32, #tpu.memory_space<vmem>>, vector<1x128xf32>
    tpu.vector_store %arg23[%c0_101, %c0_102], %237 {strides = array<i32>} : memref<1x128xf32, #tpu.memory_space<vmem>>, vector<1x128xf32>,
    %c0_i32 = arith.constant 0 : i32
    %249 = vector.broadcast %c0_i32 : i32 to vector<1x128xi32>
    %250 = arith.cmpi eq, %137, %249 : vector<1x128xi32>
    %c0_i32_103 = arith.constant 0 : i32
    %251 = vector.broadcast %c0_i32_103 : i32 to vector<1x128xi32>
    %252 = vector.shape_cast %247 : vector<1x1xi32> to vector<1x1xi32>
    %253 = vector.broadcast %252 : vector<1x1xi32> to vector<1x128xi32>
    %254 = arith.select %250, %253, %251 : vector<1x128xi1>, vector<1x128xi32>
    %c2_i32 = arith.constant 2 : i32
    %255 = vector.broadcast %c2_i32 : i32 to vector<1x1xi32>
    %256 = arith.cmpi eq, %247, %255 : vector<1x1xi32>
    %257 = arith.extui %256 : vector<1x1xi1> to vector<1x1xi32>
    %c1_i32_104 = arith.constant 1 : i32
    %c7_i32 = arith.constant 7 : i32
    %258 = arith.addi %c1_i32_104, %c7_i32 : i32
    %c1_i32_105 = arith.constant 1 : i32
    %259:8 = scf.for %arg26 = %c1_i32_104 to %258 step %c1_i32_105 iter_args(%arg27 = %201, %arg28 = %199, %arg29 = %233, %arg30 = %231, %arg31 = %247, %arg32 = %257, %arg33 = %254, %arg34 = %237) -> (vector<1x32xf32>, vector<1x32xf32>, vector<1x32xf32>, vector<1x32xf32>, vector<1x1xi32>, vector<1x1xi32>, vector<1x128xi32>, vector<1x128xf32>)  : i32 {
      %c0_i32_111 = arith.constant 0 : i32
      %262 = vector.broadcast %c0_i32_111 : i32 to vector<1x1xi32>
      %263 = arith.cmpi eq, %arg32, %262 : vector<1x1xi32>
      %cst_112 = arith.constant dense<0.000000e+00> : vector<1x8xf32>
      %264 = tpu.matmul %arg29, %134, %cst_112 {dimension_numbers = #tpu.dot_dimension_numbers<[1], [1], [0], [0], [0, 0, 1, 0], [], []>} : vector<1x32xf32>, vector<8x32xf32>, vector<1x8xf32> -> vector<1x8xf32>
      %c0_113 = arith.constant 0 : index
      %c0_114 = arith.constant 0 : index
      %265 = vector.load %arg13[%c0_113, %c0_114] : memref<8x8xf32, #tpu.memory_space<vmem>>, vector<8x8xf32>
      %cst_115 = arith.constant dense<0.000000e+00> : vector<1x8xf32>
      %266 = tpu.matmul %264, %265, %cst_115 {dimension_numbers = #tpu.dot_dimension_numbers<[1], [0], [0], [1], [0, 0, 1, 1], [], []>} : vector<1x8xf32>, vector<8x8xf32>, vector<1x8xf32> -> vector<1x8xf32>
      %c0_116 = arith.constant 0 : index
      %c0_117 = arith.constant 0 : index
      %267 = vector.load %arg14[%c0_116, %c0_117] : memref<1x8xf32, #tpu.memory_space<vmem>>, vector<1x8xf32>
      %268 = arith.addf %266, %267 : vector<1x8xf32>
      %cst_118 = arith.constant dense<0xFF800000> : vector<1xf32>
      %269 = vector.multi_reduction <maximumf>, %268, %cst_118 [1] : vector<1x8xf32> to vector<1xf32>
      %270 = vector.shape_cast %269 : vector<1xf32> to vector<1x1xf32>
      %271 = vector.broadcast %270 : vector<1x1xf32> to vector<1x8xf32>
      %272 = arith.subf %268, %271 : vector<1x8xf32>
      %273 = math.exp %272 : vector<1x8xf32>
      %cst_119 = arith.constant dense<0.000000e+00> : vector<1xf32>
      %274 = vector.multi_reduction <add>, %273, %cst_119 [1] : vector<1x8xf32> to vector<1xf32>
      %275 = vector.shape_cast %274 : vector<1xf32> to vector<1x1xf32>
      %276 = tpu.reciprocal %275 {approx = true} : vector<1x1xf32> -> vector<1x1xf32>
      %277 = vector.broadcast %276 : vector<1x1xf32> to vector<1x8xf32>
      %278 = arith.mulf %273, %277 : vector<1x8xf32>
      %279 = arith.mulf %278, %136 : vector<1x8xf32>
      %280 = vector.broadcast %arg31 : vector<1x1xi32> to vector<1x8xi32>
      %281 = arith.cmpi eq, %138, %280 : vector<1x8xi32>
      %282 = arith.extui %281 : vector<1x8xi1> to vector<1x8xi32>
      %283 = arith.sitofp %282 : vector<1x8xi32> to vector<1x8xf32>
      %c0_120 = arith.constant 0 : index
      %c0_121 = arith.constant 0 : index
      %284 = vector.load %arg15[%c0_120, %c0_121] : memref<8x32xf32, #tpu.memory_space<vmem>>, vector<8x32xf32>
      %cst_122 = arith.constant dense<0.000000e+00> : vector<1x32xf32>
      %285 = tpu.matmul %283, %284, %cst_122 {dimension_numbers = #tpu.dot_dimension_numbers<[1], [0], [0], [1], [0, 0, 1, 1], [], []>} : vector<1x8xf32>, vector<8x32xf32>, vector<1x32xf32> -> vector<1x32xf32>
      %c0_123 = arith.constant 0 : index
      %c0_124 = arith.constant 0 : index
      %286 = vector.load %arg16[%c0_123, %c0_124] : memref<8x32xf32, #tpu.memory_space<vmem>>, vector<8x32xf32>
      %cst_125 = arith.constant dense<0.000000e+00> : vector<1x32xf32>
      %287 = tpu.matmul %279, %286, %cst_125 {dimension_numbers = #tpu.dot_dimension_numbers<[1], [0], [0], [1], [0, 0, 1, 1], [], []>} : vector<1x8xf32>, vector<8x32xf32>, vector<1x32xf32> -> vector<1x32xf32>
      %c0_126 = arith.constant 0 : index
      %c0_127 = arith.constant 0 : index
      %288 = vector.load %arg17[%c0_126, %c0_127] : memref<32x32xf32, #tpu.memory_space<vmem>>, vector<32x32xf32>
      %cst_128 = arith.constant dense<0.000000e+00> : vector<1x32xf32>
      %289 = tpu.matmul %285, %288, %cst_128 {dimension_numbers = #tpu.dot_dimension_numbers<[1], [0], [0], [1], [0, 0, 1, 1], [], []>} : vector<1x32xf32>, vector<32x32xf32>, vector<1x32xf32> -> vector<1x32xf32>
      %290 = arith.addf %287, %289 : vector<1x32xf32>
      %c0_129 = arith.constant 0 : index
      %c0_130 = arith.constant 0 : index
      %291 = vector.load %arg18[%c0_129, %c0_130] : memref<1x32xf32, #tpu.memory_space<vmem>>, vector<1x32xf32>
      %292 = arith.addf %290, %291 : vector<1x32xf32>
      %c0_131 = arith.constant 0 : index
      %c0_132 = arith.constant 0 : index
      %293 = vector.load %arg7[%c0_131, %c0_132] : memref<32x128xf32, #tpu.memory_space<vmem>>, vector<32x128xf32>
      %cst_133 = arith.constant dense<0.000000e+00> : vector<1x128xf32>
      %294 = tpu.matmul %292, %293, %cst_133 {dimension_numbers = #tpu.dot_dimension_numbers<[1], [0], [0], [1], [0, 0, 1, 1], [], []>} : vector<1x32xf32>, vector<32x128xf32>, vector<1x128xf32> -> vector<1x128xf32>
      %c0_134 = arith.constant 0 : index
      %c0_135 = arith.constant 0 : index
      %295 = vector.load %arg8[%c0_134, %c0_135] : memref<32x128xf32, #tpu.memory_space<vmem>>, vector<32x128xf32>
      %cst_136 = arith.constant dense<0.000000e+00> : vector<1x128xf32>
      %296 = tpu.matmul %arg27, %295, %cst_136 {dimension_numbers = #tpu.dot_dimension_numbers<[1], [0], [0], [1], [0, 0, 1, 1], [], []>} : vector<1x32xf32>, vector<32x128xf32>, vector<1x128xf32> -> vector<1x128xf32>
      %297 = arith.addf %294, %296 : vector<1x128xf32>
      %c0_137 = arith.constant 0 : index
      %c0_138 = arith.constant 0 : index
      %298 = vector.load %arg9[%c0_137, %c0_138] : memref<1x128xf32, #tpu.memory_space<vmem>>, vector<1x128xf32>
      %299 = arith.addf %297, %298 : vector<1x128xf32>
      %300 = vector.extract_strided_slice %299 {offsets = [0, 0], sizes = [1, 32], strides = [1, 1]} : vector<1x128xf32> to vector<1x32xf32>
      %301 = arith.negf %300 : vector<1x32xf32>
      %302 = math.exp %301 : vector<1x32xf32>
      %cst_139 = arith.constant 1.000000e+00 : f32
      %303 = vector.broadcast %cst_139 : f32 to vector<1x32xf32>
      %304 = arith.addf %303, %302 : vector<1x32xf32>
      %305 = arith.divf %303, %304 : vector<1x32xf32>
      %306 = vector.extract_strided_slice %299 {offsets = [0, 32], sizes = [1, 32], strides = [1, 1]} : vector<1x128xf32> to vector<1x32xf32>
      %307 = arith.negf %306 : vector<1x32xf32>
      %308 = math.exp %307 : vector<1x32xf32>
      %cst_140 = arith.constant 1.000000e+00 : f32
      %309 = vector.broadcast %cst_140 : f32 to vector<1x32xf32>
      %310 = arith.addf %309, %308 : vector<1x32xf32>
      %311 = arith.divf %309, %310 : vector<1x32xf32>
      %312 = vector.extract_strided_slice %299 {offsets = [0, 64], sizes = [1, 32], strides = [1, 1]} : vector<1x128xf32> to vector<1x32xf32>
      %313 = math.tanh %312 : vector<1x32xf32>
      %314 = vector.extract_strided_slice %299 {offsets = [0, 96], sizes = [1, 32], strides = [1, 1]} : vector<1x128xf32> to vector<1x32xf32>
      %315 = arith.negf %314 : vector<1x32xf32>
      %316 = math.exp %315 : vector<1x32xf32>
      %cst_141 = arith.constant 1.000000e+00 : f32
      %317 = vector.broadcast %cst_141 : f32 to vector<1x32xf32>
      %318 = arith.addf %317, %316 : vector<1x32xf32>
      %319 = arith.divf %317, %318 : vector<1x32xf32>
      %320 = arith.mulf %311, %arg28 : vector<1x32xf32>
      %321 = arith.mulf %305, %313 : vector<1x32xf32>
      %322 = arith.addf %320, %321 : vector<1x32xf32>
      %323 = math.tanh %322 : vector<1x32xf32>
      %324 = arith.mulf %319, %323 : vector<1x32xf32>
      %c0_142 = arith.constant 0 : index
      %c0_143 = arith.constant 0 : index
      %325 = vector.load %arg10[%c0_142, %c0_143] : memref<32x128xf32, #tpu.memory_space<vmem>>, vector<32x128xf32>
      %cst_144 = arith.constant dense<0.000000e+00> : vector<1x128xf32>
      %326 = tpu.matmul %324, %325, %cst_144 {dimension_numbers = #tpu.dot_dimension_numbers<[1], [0], [0], [1], [0, 0, 1, 1], [], []>} : vector<1x32xf32>, vector<32x128xf32>, vector<1x128xf32> -> vector<1x128xf32>
      %c0_145 = arith.constant 0 : index
      %c0_146 = arith.constant 0 : index
      %327 = vector.load %arg11[%c0_145, %c0_146] : memref<32x128xf32, #tpu.memory_space<vmem>>, vector<32x128xf32>
      %cst_147 = arith.constant dense<0.000000e+00> : vector<1x128xf32>
      %328 = tpu.matmul %arg29, %327, %cst_147 {dimension_numbers = #tpu.dot_dimension_numbers<[1], [0], [0], [1], [0, 0, 1, 1], [], []>} : vector<1x32xf32>, vector<32x128xf32>, vector<1x128xf32> -> vector<1x128xf32>
      %329 = arith.addf %326, %328 : vector<1x128xf32>
      %c0_148 = arith.constant 0 : index
      %c0_149 = arith.constant 0 : index
      %330 = vector.load %arg12[%c0_148, %c0_149] : memref<1x128xf32, #tpu.memory_space<vmem>>, vector<1x128xf32>
      %331 = arith.addf %329, %330 : vector<1x128xf32>
      %332 = vector.extract_strided_slice %331 {offsets = [0, 0], sizes = [1, 32], strides = [1, 1]} : vector<1x128xf32> to vector<1x32xf32>
      %333 = arith.negf %332 : vector<1x32xf32>
      %334 = math.exp %333 : vector<1x32xf32>
      %cst_150 = arith.constant 1.000000e+00 : f32
      %335 = vector.broadcast %cst_150 : f32 to vector<1x32xf32>
      %336 = arith.addf %335, %334 : vector<1x32xf32>
      %337 = arith.divf %335, %336 : vector<1x32xf32>
      %338 = vector.extract_strided_slice %331 {offsets = [0, 32], sizes = [1, 32], strides = [1, 1]} : vector<1x128xf32> to vector<1x32xf32>
      %339 = arith.negf %338 : vector<1x32xf32>
      %340 = math.exp %339 : vector<1x32xf32>
      %cst_151 = arith.constant 1.000000e+00 : f32
      %341 = vector.broadcast %cst_151 : f32 to vector<1x32xf32>
      %342 = arith.addf %341, %340 : vector<1x32xf32>
      %343 = arith.divf %341, %342 : vector<1x32xf32>
      %344 = vector.extract_strided_slice %331 {offsets = [0, 64], sizes = [1, 32], strides = [1, 1]} : vector<1x128xf32> to vector<1x32xf32>
      %345 = math.tanh %344 : vector<1x32xf32>
      %346 = vector.extract_strided_slice %331 {offsets = [0, 96], sizes = [1, 32], strides = [1, 1]} : vector<1x128xf32> to vector<1x32xf32>
      %347 = arith.negf %346 : vector<1x32xf32>
      %348 = math.exp %347 : vector<1x32xf32>
      %cst_152 = arith.constant 1.000000e+00 : f32
      %349 = vector.broadcast %cst_152 : f32 to vector<1x32xf32>
      %350 = arith.addf %349, %348 : vector<1x32xf32>
      %351 = arith.divf %349, %350 : vector<1x32xf32>
      %352 = arith.mulf %343, %arg30 : vector<1x32xf32>
      %353 = arith.mulf %337, %345 : vector<1x32xf32>
      %354 = arith.addf %352, %353 : vector<1x32xf32>
      %355 = math.tanh %354 : vector<1x32xf32>
      %356 = arith.mulf %351, %355 : vector<1x32xf32>
      %c0_153 = arith.constant 0 : index
      %c0_154 = arith.constant 0 : index
      %357 = vector.load %arg19[%c0_153, %c0_154] : memref<32x128xf32, #tpu.memory_space<vmem>>, vector<32x128xf32>
      %cst_155 = arith.constant dense<0.000000e+00> : vector<1x128xf32>
      %358 = tpu.matmul %356, %357, %cst_155 {dimension_numbers = #tpu.dot_dimension_numbers<[1], [0], [0], [1], [0, 0, 1, 1], [], []>} : vector<1x32xf32>, vector<32x128xf32>, vector<1x128xf32> -> vector<1x128xf32>
      %c0_156 = arith.constant 0 : index
      %c0_157 = arith.constant 0 : index
      %359 = vector.load %arg20[%c0_156, %c0_157] : memref<1x128xf32, #tpu.memory_space<vmem>>, vector<1x128xf32>
      %360 = arith.addf %358, %359 : vector<1x128xf32>
      %cst_158 = arith.constant dense<0xFF800000> : vector<1xf32>
      %361 = vector.multi_reduction <maximumf>, %360, %cst_158 [1] : vector<1x128xf32> to vector<1xf32>
      %362 = vector.shape_cast %361 : vector<1xf32> to vector<1x1xf32>
      %363 = vector.broadcast %362 : vector<1x1xf32> to vector<1x128xf32>
      %364 = arith.cmpf oge, %360, %363 : vector<1x128xf32>
      %c128_i32_159 = arith.constant 128 : i32
      %365 = vector.broadcast %c128_i32_159 : i32 to vector<1x128xi32>
      %366 = arith.select %364, %137, %365 : vector<1x128xi1>, vector<1x128xi32>
      %cst_160 = arith.constant dense<2147483647> : vector<1xi32>
      %367 = vector.multi_reduction <minsi>, %366, %cst_160 [1] : vector<1x128xi32> to vector<1xi32>
      %368 = vector.shape_cast %367 : vector<1xi32> to vector<1x1xi32>
      %c1_i32_161 = arith.constant 1 : i32
      %369 = vector.broadcast %c1_i32_161 : i32 to vector<1x1xi32>
      %370 = arith.addi %368, %369 : vector<1x1xi32>
      %371 = vector.broadcast %arg26 : i32 to vector<1x128xi32>
      %372 = arith.cmpi eq, %137, %371 : vector<1x128xi32>
      %373 = vector.broadcast %263 : vector<1x1xi1> to vector<1x128xi1>
      %374 = arith.andi %372, %373 : vector<1x128xi1>
      %375 = vector.shape_cast %370 : vector<1x1xi32> to vector<1x1xi32>
      %376 = vector.broadcast %375 : vector<1x1xi32> to vector<1x128xi32>
      %377 = arith.select %374, %376, %arg33 : vector<1x128xi1>, vector<1x128xi32>
      %378 = vector.shape_cast %263 : vector<1x1xi1> to vector<1x1xi1>
      %379 = vector.broadcast %378 : vector<1x1xi1> to vector<1x128xi1>
      %380 = arith.select %379, %360, %arg34 : vector<1x128xi1>, vector<1x128xf32>
      %381 = vector.shape_cast %263 : vector<1x1xi1> to vector<1x1xi1>
      %382 = vector.broadcast %381 : vector<1x1xi1> to vector<1x32xi1>
      %383 = arith.select %382, %324, %arg27 : vector<1x32xi1>, vector<1x32xf32>
      %384 = vector.shape_cast %263 : vector<1x1xi1> to vector<1x1xi1>
      %385 = vector.broadcast %384 : vector<1x1xi1> to vector<1x32xi1>
      %386 = arith.select %385, %322, %arg28 : vector<1x32xi1>, vector<1x32xf32>
      %387 = vector.shape_cast %263 : vector<1x1xi1> to vector<1x1xi1>
      %388 = vector.broadcast %387 : vector<1x1xi1> to vector<1x32xi1>
      %389 = arith.select %388, %356, %arg29 : vector<1x32xi1>, vector<1x32xf32>
      %390 = vector.shape_cast %263 : vector<1x1xi1> to vector<1x1xi1>
      %391 = vector.broadcast %390 : vector<1x1xi1> to vector<1x32xi1>
      %392 = arith.select %391, %354, %arg30 : vector<1x32xi1>, vector<1x32xf32>
      %393 = arith.select %263, %370, %arg31 : vector<1x1xi1>, vector<1x1xi32>
      %c2_i32_162 = arith.constant 2 : i32
      %394 = vector.broadcast %c2_i32_162 : i32 to vector<1x1xi32>
      %395 = arith.cmpi eq, %370, %394 : vector<1x1xi32>
      %396 = arith.extui %395 : vector<1x1xi1> to vector<1x1xi32>
      %397 = arith.maxsi %arg32, %396 : vector<1x1xi32>
      scf.yield %383, %386, %389, %392, %393, %397, %377, %380 : vector<1x32xf32>, vector<1x32xf32>, vector<1x32xf32>, vector<1x32xf32>, vector<1x1xi32>, vector<1x1xi32>, vector<1x128xi32>, vector<1x128xf32>
    }
    %c7_i32_106 = arith.constant 7 : i32
    %c0_107 = arith.constant 0 : index
    %c0_108 = arith.constant 0 : index
    %260 = vector.load %arg22[%c0_107, %c0_108] : memref<1x128xi32, #tpu.memory_space<vmem>>, vector<1x128xi32>
    tpu.vector_store %arg22[%c0_107, %c0_108], %259#6 {strides = array<i32>} : memref<1x128xi32, #tpu.memory_space<vmem>>, vector<1x128xi32>,
    %c0_109 = arith.constant 0 : index
    %c0_110 = arith.constant 0 : index
    %261 = vector.load %arg24[%c0_109, %c0_110] : memref<1x128xf32, #tpu.memory_space<vmem>>, vector<1x128xf32>
    tpu.vector_store %arg24[%c0_109, %c0_110], %259#7 {strides = array<i32>} : memref<1x128xf32, #tpu.memory_space<vmem>>, vector<1x128xf32>,
    return
  }
}

</mosaic_0001>

<bundles_post_ra>
// kernel: attention_forward.1
= control target key start
LH: loop header
LB: loop body
LE: loop exit
PB: predicated region body
PF: predicated region fallthrough
CT: control target
= control target key end

     0   :  { %s4239_s0 = inlined_call_operand.vmem [shape: f32[2,32], index: 0, kind: input, shape index: {}]   ;;  %s4240_s1 = inlined_call_operand.vmem [shape: f32[32,128], index: 1, kind: input, shape index: {}]   ;;  %s4241_s2 = inlined_call_operand.vmem [shape: f32[32,128], index: 2, kind: input, shape index: {}]   ;;  %s4242_s3 = inlined_call_operand.vmem [shape: f32[1,128], index: 3, kind: input, shape index: {}]   ;;  %s4243_s4 = inlined_call_operand.vmem [shape: f32[32,128], index: 4, kind: input, shape index: {}]   ;;  %s4244_s5 = inlined_call_operand.vmem [shape: f32[32,128], index: 5, kind: input, shape index: {}]   ;;  %s4245_s6 = inlined_call_operand.vmem [shape: f32[1,128], index: 6, kind: input, shape index: {}]   ;;  %s4246_s7 = inlined_call_operand.vmem [shape: f32[32,128], index: 7, kind: input, shape index: {}]   ;;  %s4247_s8 = inlined_call_operand.vmem [shape: f32[32,128], index: 8, kind: input, shape index: {}]   ;;  %s4248_s9 = inlined_call_operand.vmem [shape: f32[1,128], index: 9, kind: input, shape index: {}]   ;;  %s4249_s10 = inlined_call_operand.vmem [shape: f32[32,128], index: 10, kind: input, shape index: {}]   ;;  %s4250_s11 = inlined_call_operand.vmem [shape: f32[32,128], index: 11, kind: input, shape index: {}]   ;;  %s4251_s12 = inlined_call_operand.vmem [shape: f32[1,128], index: 12, kind: input, shape index: {}]   ;;  %s4252_s13 = inlined_call_operand.vmem [shape: f32[8,8], index: 13, kind: input, shape index: {}]   ;;  %s4253_s14 = inlined_call_operand.vmem [shape: f32[1,8], index: 14, kind: input, shape index: {}]   ;;  %s4254_s15 = inlined_call_operand.vmem [shape: f32[8,32], index: 15, kind: input, shape index: {}]   ;;  %s4255_s16 = inlined_call_operand.vmem [shape: f32[8,32], index: 16, kind: input, shape index: {}]   ;;  %s4256_s17 = inlined_call_operand.vmem [shape: f32[32,32], index: 17, kind: input, shape index: {}]   ;;  %s4257_s18 = inlined_call_operand.vmem [shape: f32[1,32], index: 18, kind: input, shape index: {}]   ;;  %s4258_s19 = inlined_call_operand.vmem [shape: f32[32,128], index: 19, kind: input, shape index: {}]   ;;  %s4259_s20 = inlined_call_operand.vmem [shape: f32[1,128], index: 20, kind: input, shape index: {}]   ;;  %s4260_s21 = inlined_call_operand.<no memory space> [shape: s32[1], index: 21, kind: input, shape index: {}]   ;;  %s4261_s22 = inlined_call_operand.hbm [shape: s32[1,128], index: 22, kind: output, shape index: {0}]   ;;  %s4262_s23 = inlined_call_operand.hbm [shape: f32[1,128], index: 23, kind: output, shape index: {1}]   ;;  %s4263_s24 = inlined_call_operand.hbm [shape: f32[1,128], index: 24, kind: output, shape index: {2}]  }
   0x1   :  { %4276 = sst [smem:[#allocation11_spill]] %s4239_s0 }
   0x2   :  { %4277 = sst [smem:[#allocation12_spill]] %s4240_s1 }
   0x3   :  { %4278 = sst [smem:[#allocation13_spill]] %s4241_s2 }
   0x4   :  { %4279 = sst [smem:[#allocation14_spill]] %s4242_s3 }
   0x5   :  { %4280 = sst [smem:[#allocation15_spill]] %s4243_s4 }
   0x6   :  { %4281 = sst [smem:[#allocation16_spill]] %s4244_s5 }
   0x7   :  { %4282 = sst [smem:[#allocation17_spill]] %s4245_s6 }
   0x8   :  { %4283 = sst [smem:[#allocation18_spill]] %s4246_s7 }
   0x9   :  { %4284 = sst [smem:[#allocation19_spill]] %s4247_s8 }
   0xa   :  { %31 = vsyncpa [#allocation5], 0 }
   0xb   :  { %32 = vsyncpa [#allocation7], 0  ;;  %s4285_s27 = sld [smem:[#allocation12_spill]]  ;;  %v3464_v2 = vmov 0.0|0.0   ;;  %s4286_s0 = sld [smem:[#allocation13_spill]]  ;;  %vm82_vm0 = vcmask 261120  }
   0xc   :  { %3048 = vmatprep.subr.bf16.mxu0 %v3464_v2  ;;  %3054 = vmatprep.subr.bf16.mxu1 %v3464_v2  ;;  %vm3465_vm1 = vmmov 0   ;;  %v3466_v11 = vmov 0.0   ;;  %s4287_s2 = sld [smem:[#allocation11_spill]]  ;;  %s4288_s7 = sld [smem:[#allocation14_spill]]  ;;  %vm444_vm2 = vcmask 253952   ;;  %vm900_vm3 = vcmask 64512  }
   0xd   :  { %2802 = vmatprep.mubr.msk.f32.mxu0 %vm3465_vm1, %v3466_v11  ;;  %2813 = vmatprep.mubr.msk.f32.mxu1 %vm3465_vm1, %v3466_v11  ;;  %156 = vst.msk [vmem:[#allocation2] sm:$0xff] %vm82_vm0, %v3466_v11  ;;  %s3467_s30 = smov 64   ;;  %s4274_s3 = smov 32   ;;  %vm974_vm5 = vcmask 57344   ;;  %vm1657_vm6 = vcmask 1040384  }
   0xe   :  { %s4289_s4 = sld [smem:[#allocation16_spill]] }
  0x11   :  { %v78_v0 = vld [vmem:[%s4285_s27] sm:$0xff]  ;;  %v79_v1 = vld [vmem:[%s4285_s27 + $0x8] sm:$0xff]  ;;  %v80_v6 = vld [vmem:[%s4285_s27 + $0x10] sm:$0xff] }
  0x12   :  { %v3049_v3 = vpack.c.bf16 %v79_v1, %v78_v0  ;;  %v157_v4 = vld [vmem:[%s4286_s0] sm:$0xff]  ;;  %v158_v5 = vld [vmem:[%s4286_s0 + $0x8] sm:$0xff]  ;;  %v81_v8 = vld [vmem:[%s4285_s27 + $0x18] sm:$0xff]  ;;  %s4292_s27 = sld [smem:[#allocation17_spill]] }
  0x13   :  { %v3622_v7 = vpack.c.bf16 %v158_v5, %v157_v4  ;;  %v159_v9 = vld [vmem:[%s4286_s0 + $0x10] sm:$0xff]  ;;  %v160_v10 = vld [vmem:[%s4286_s0 + $0x18] sm:$0xff]  ;;  %v3052_v12 = vpack.c.bf16 %v81_v8, %v80_v6  ;;  %v77_v14 = vld [vmem:[%s4287_s2] sm:$0x3]  ;;  %s4290_s0 = sld [smem:[#allocation15_spill]]  ;;  %s4294_s2 = sld [smem:[#allocation19_spill]] }
  0x14   :  { %3050 = vmatpush3.bf16.msra.mxu0 %v3049_v3  ;;  %v3058_v13 = vpack.c.bf16 %v160_v10, %v159_v9  ;;  %v235_v17 = vld [vmem:[%s4288_s7] sm:$0x1]  ;;  %v266_v33 = vld [vmem:[%s4289_s4 + $0x8] sm:$0xff]  ;;  %v267_v34 = vld [vmem:[%s4289_s4 + $0x10] sm:$0xff] }
  0x15   :  { %3056 = vmatpush3.bf16.msra.mxu1 %v3622_v7  ;;  %3051 = vmatprep.subr.bf16.mxu0 %v3464_v2  ;;  %v265_v32 = vld [vmem:[%s4289_s4] sm:$0xff]  ;;  %v268_v36 = vld [vmem:[%s4289_s4 + $0x18] sm:$0xff]  ;;  %s4293_s4 = sld [smem:[#allocation18_spill]] }
  0x16   :  { %3057 = vmatprep.subr.bf16.mxu1 %v3464_v2  ;;  %v3061_v35 = vpack.c.bf16 %v266_v33, %v265_v32  ;;  %v3064_v42 = vpack.c.bf16 %v268_v36, %v267_v34  ;;  %v2646_v57 = vld [vmem:[%s4288_s7] ss:$0 sm:$0xff] }
  0x18   :  { %3053 = vmatpush3.bf16.msra.mxu0 %v3052_v12  ;;  %v414_v51 = vld [vmem:[%s4292_s27] sm:$0x1] }
  0x19   :  { %3059 = vmatpush3.bf16.msra.mxu1 %v3058_v13  ;;  %3060 = vmatprep.subr.bf16.mxu0 %v3464_v2  ;;  %v261_v37 = vld [vmem:[%s4290_s0] sm:$0xff]  ;;  %v262_v38 = vld [vmem:[%s4290_s0 + $0x8] sm:$0xff]  ;;  %v263_v40 = vld [vmem:[%s4290_s0 + $0x10] sm:$0xff] }
  0x1a   :  { %3066 = vmatprep.subr.bf16.mxu1 %v3464_v2  ;;  %v3067_v39 = vpack.c.bf16 %v262_v38, %v261_v37  ;;  %v264_v41 = vld [vmem:[%s4290_s0 + $0x18] sm:$0xff]  ;;  %v715_v32 = vld [vmem:[%s4292_s27] sm:$0x1] }
  0x1b   :  { %2803 = vmatmul.mubr.msk.f32.vlgmr.msra.gmra.mrb[0].mxu0 %vm82_vm0, %v77_v14  ;;  %v3070_v43 = vpack.c.bf16 %v264_v41, %v263_v40 }
  0x1c   :  { %2814 = vmatmul.mubr.f32.vlgmr.msra.gmra.mrb[0].mxu1 %v3466_v11  ;;  %2824 = vmatprep.mubr.msk.f32.mxu0 %vm3465_vm1, %v3466_v11 }
  0x1d   :  { %2835 = vmatprep.mubr.msk.f32.mxu1 %vm3465_vm1, %v3466_v11  ;;  %3062 = vmatpush3.bf16.msra.mxu0 %v3061_v35 }
  0x1e   :  { %3063 = vmatprep.subr.bf16.mxu0 %v3464_v2  ;;  %3068 = vmatpush3.bf16.msra.mxu1 %v3067_v39 }
  0x1f   :  { %3069 = vmatprep.subr.bf16.mxu1 %v3464_v2 }
  0x21   :  { %3065 = vmatpush3.bf16.msra.mxu0 %v3064_v42 }
  0x22   :  { %3072 = vmatprep.subr.bf16.mxu0 %v3464_v2  ;;  %3071 = vmatpush3.bf16.msra.mxu1 %v3070_v43 }
  0x23   :  { %3078 = vmatprep.subr.bf16.mxu1 %v3464_v2 }
  0x24   :  { %2825 = vmatmul.mubr.f32.vlgmr.msra.gmra.mrb[2].mxu0 %v3466_v11 }
  0x25   :  { %3074 = vmatpush3.bf16.msra.mxu0 %v3622_v7  ;;  %2846 = vmatprep.mubr.msk.f32.mxu0 %vm3465_vm1, %v3466_v11 }
  0x26   :  { %3075 = vmatprep.subr.bf16.mxu0 %v3464_v2 }
  0x29   :  { %3077 = vmatpush3.bf16.msra.mxu0 %v3058_v13 }
  0x2a   :  { %3084 = vmatprep.subr.bf16.mxu0 %v3464_v2 }
  0xee   :  { %v3653_v15 = vpop.f32.mrb[0].mxu0 }
  0xef   :  { %v230_v16 = vpop.f32.mrb[0].mxu1  ;;  %v2804_v18 = vpop.f32.mrb[1].mxu0 }
  0xf0   :  { %v234_v19 = vadd.f32 %v230_v16, %v3653_v15  ;;  %v2815_v20 = vpop.f32.mrb[1].mxu1 }
  0xf2   :  { %v236_v21 = vadd.f32 %v235_v17, %v234_v19 }
  0xf4   :  { %3250 = vtanh.f32 %v236_v21  ;;  %v2642_v23 = vmul.f32 -1.442695, %v236_v21 }
  0xf6   :  { %3252 = vpow2.f32 %v2642_v23 }
  0xf7   :  { %v335_v47 = vpop.f32.mrb[2].mxu0 }
  0xf8   :  { %v2826_v48 = vpop.f32.mrb[3].mxu0 }
  0xfe   :  { %v3251_v22 = vpop.eup %3250 }
  0xff   :  { %246 = vrot.lane.b32.xlu0 %v3251_v22, %s3467_s30 }
 0x100   :  { %v3253_v24 = vpop.eup %3252 }
 0x101   :  { %v240_v25 = vadd.f32 1.0, %v3253_v24 }
 0x103   :  { %3254 = vrcp.f32 %v240_v25 }
 0x10d   :  { %v3255_v26 = vpop.eup %3254 }
 0x10e   :  { %v244_v29 = vmul.f32 0.0, %v3255_v26 }
 0x171   :  { %v247_v27 = vpop.permute.xlu0 %246 }
 0x172   :  { %v249_v28 = vmul.f32 %v3255_v26, %v247_v27 }
 0x174   :  { %251 = vrot.lane.b32.xlu0 %v249_v28, %s4274_s3  ;;  %s4291_s3 = smov 32  }
 0x1e6   :  { %v252_v30 = vpop.permute.xlu0 %251 }
 0x1e7   :  { %v3661_v31 = vadd.f32 %v252_v30, %v244_v29 }
 0x1e9   :  { %3256 = vtanh.f32 %v3661_v31  ;;  %v540_v14 = vrot.slane %v3661_v31, 7 }
 0x1f3   :  { %v3257_v44 = vpop.eup %3256 }
 0x1f4   :  { %257 = vrot.lane.b32.xlu1 %v3257_v44, %s3467_s30 }
 0x266   :  { %v258_v45 = vpop.permute.xlu1 %257 }
 0x267   :  { %v260_v46 = vmul.f32 %v3255_v26, %v258_v45 }
 0x269   :  { %340 = vrot.lane.b32.xlu1 %v260_v46, %s4291_s3 }
 0x2db   :  { %v341_v49 = vpop.permute.xlu1 %340 }
 0x2dc   :  { %2836 = vmatmul.mubr.msk.f32.vlgmr.msra.gmra.mrb[2].mxu1 %vm82_vm0, %v341_v49  ;;  %2847 = vmatmul.mubr.msk.f32.vlgmr.msra.gmra.mrb[4].mxu0 %vm82_vm0, %v341_v49 }
 0x2dd   :  { %3080 = vmatpush3.bf16.msra.mxu1 %v3061_v35  ;;  %3086 = vmatpush3.bf16.msra.mxu0 %v3067_v39 }
 0x2de   :  { %3081 = vmatprep.subr.bf16.mxu1 %v3464_v2  ;;  %2857 = vmatprep.mubr.msk.f32.mxu1 %vm3465_vm1, %v3466_v11 }
 0x2df   :  { %3087 = vmatprep.subr.bf16.mxu0 %v3464_v2  ;;  %2868 = vmatprep.mubr.msk.f32.mxu0 %vm3465_vm1, %v3466_v11 }
 0x2e1   :  { %3083 = vmatpush3.bf16.msra.mxu1 %v3064_v42  ;;  %3089 = vmatpush3.bf16.msra.mxu0 %v3070_v43 }
 0x2e2   :  { %2871 = vmatprep.subr.mxu1 %v3466_v11  ;;  %2881 = vmatprep.subr.mxu0 %v3466_v11 }
 0x3af   :  { %v410_v50 = vpop.f32.mrb[2].mxu1  ;;  %v516_v52 = vpop.f32.mrb[4].mxu0 }
 0x3b0   :  { %v411_v53 = vadd.f32 %v410_v50, %v335_v47  ;;  %v521_v54 = vrot.slane %v516_v52, 7  ;;  %v2837_v55 = vpop.f32.mrb[3].mxu1  ;;  %v2848_v56 = vpop.f32.mrb[5].mxu0  ;;  %v898_v52 = vld [vmem:[%s4252_s13] sm:$0xff] }
 0x3b2   :  { %v415_v58 = vadd.f32 %v414_v51, %v411_v53  ;;  %v523_v59 = vadd.f32 %v521_v54, %v3653_v15  ;;  %v3469_v51 = vmov 1.0  }
 0x3b4   :  { %3258 = vtanh.f32 %v415_v58  ;;  %v531_v60 = vadd.f32 %v2646_v57, %v523_v59  ;;  %v2644_v63 = vmul.f32 -1.442695, %v415_v58  ;;  %v991_v57 = vld [vmem:[%s4254_s15] sm:$0xff]  ;;  %v823_v58 = vlaneseq }
 0x3b5   :  { %v987_v59 = vstv %s4260_s21 }
 0x3b6   :  { %3260 = vtanh.f32 %v531_v60  ;;  %v2647_v0 = vmul.f32 -1.442695, %v531_v60  ;;  %v3783_v60 = vand.u32 127, %v823_v58 }
 0x3b7   :  { %3262 = vpow2.f32 %v2644_v63 }
 0x3b8   :  { %3264 = vpow2.f32 %v2647_v0  ;;  %vm988_vm4 = vcmp.eq.s32.totalorder %v3783_v60, %v987_v59  ;;  %vm1680_vm9 = vcmp.eq.s32.totalorder %v3783_v60, 0 }
 0x3be   :  { %v3259_v61 = vpop.eup %3258 }
 0x3bf   :  { %425 = vrot.lane.b32.xlu1 %v3259_v61, %s3467_s30  ;;  %v2656_v61 = vsel %vm988_vm4, 1.0, %v3466_v11 }
 0x3c0   :  { %v3261_v62 = vpop.eup %3260 }
 0x3c1   :  { %544 = vrot.lane.b32.xlu0 %v3261_v62, %s3467_s30  ;;  %v3263_v1 = vpop.eup %3262  ;;  %v899_v62 = vld [vmem:[%s4253_s14] sm:$0x1] }
 0x3c2   :  { %v3265_v3 = vpop.eup %3264  ;;  %v419_v4 = vadd.f32 1.0, %v3263_v1 }
 0x3c3   :  { %v535_v5 = vadd.f32 1.0, %v3265_v3 }
 0x3c4   :  { %3266 = vrcp.f32 %v419_v4 }
 0x3c5   :  { %3268 = vrcp.f32 %v535_v5 }
 0x3ce   :  { %v3267_v6 = vpop.eup %3266 }
 0x3cf   :  { %v3269_v9 = vpop.eup %3268  ;;  %v423_v13 = vmul.f32 0.0, %v3267_v6 }
 0x3d0   :  { %v542_v17 = vmul.f32 %v3269_v9, %v540_v14  ;;  %v1069_v14 = vld [vmem:[%s4256_s17 + $0x18] sm:$0xff] }
 0x431   :  { %v426_v7 = vpop.permute.xlu1 %425 }
 0x432   :  { %v428_v8 = vmul.f32 %v3267_v6, %v426_v7 }
 0x433   :  { %v545_v10 = vpop.permute.xlu0 %544 }
 0x434   :  { %430 = vrot.lane.b32.xlu1 %v428_v8, %s4291_s3  ;;  %v547_v12 = vmul.f32 %v3269_v9, %v545_v10  ;;  %v1067_v10 = vld [vmem:[%s4256_s17 + $0x8] sm:$0xff] }
 0x436   :  { %549 = vrot.lane.b32.xlu0 %v547_v12, %s4291_s3 }
 0x4a6   :  { %v431_v15 = vpop.permute.xlu1 %430 }
 0x4a7   :  { %v433_v16 = vadd.f32 %v431_v15, %v423_v13  ;;  %v1068_v13 = vld [vmem:[%s4256_s17 + $0x10] sm:$0xff] }
 0x4a8   :  { %v550_v18 = vpop.permute.xlu0 %549  ;;  %v3094_v15 = vpack.c.bf16 %v1069_v14, %v1068_v13 }
 0x4a9   :  { %3270 = vtanh.f32 %v433_v16  ;;  %v3722_v19 = vadd.f32 %v550_v18, %v542_v17 }
 0x4ab   :  { %3272 = vtanh.f32 %v3722_v19 }
 0x4b3   :  { %v3271_v20 = vpop.eup %3270 }
 0x4b4   :  { %436 = vrot.lane.b32.xlu1 %v3271_v20, %s3467_s30  ;;  %v1218_v20 = vld [vmem:[%s4293_s4] sm:$0xff] }
 0x4b5   :  { %v3273_v21 = vpop.eup %3272 }
 0x4b6   :  { %555 = vrot.lane.b32.xlu0 %v3273_v21, %s3467_s30  ;;  %v1219_v21 = vld [vmem:[%s4293_s4 + $0x8] sm:$0xff] }
 0x526   :  { %v437_v22 = vpop.permute.xlu1 %436 }
 0x527   :  { %v439_v23 = vmul.f32 %v3267_v6, %v437_v22  ;;  %v3103_v22 = vpack.c.bf16 %v1219_v21, %v1218_v20  ;;  %v1551_v21 = vld [vmem:[%s4251_s12] sm:$0x1] }
 0x528   :  { %v556_v24 = vpop.permute.xlu0 %555 }
 0x529   :  { %441 = vrot.lane.b32.xlu0 %v439_v23, %s4291_s3  ;;  %v558_v25 = vmul.f32 %v3269_v9, %v556_v24  ;;  %v1066_v9 = vld [vmem:[%s4256_s17] sm:$0xff] }
 0x52a   :  { %v3091_v12 = vpack.c.bf16 %v1067_v10, %v1066_v9  ;;  %v1222_v24 = vld [vmem:[%s4294_s2] sm:$0xff]  ;;  %v1399_v10 = vld [vmem:[%s4249_s10 + $0x8] sm:$0xff] }
 0x52b   :  { %v640_v26 = vrot.slane %v558_v25, 1  ;;  %v1223_v25 = vld [vmem:[%s4294_s2 + $0x8] sm:$0xff]  ;;  %v1398_v9 = vld [vmem:[%s4249_s10] sm:$0xff] }
 0x52c   :  { %v3115_v13 = vpack.c.bf16 %v1399_v10, %v1398_v9 }
 0x52d   :  { %641 = vrot.lane.b32.xlu1 %v640_v26, %s4291_s3 }
 0x59b   :  { %v442_v27 = vpop.permute.xlu0 %441 }
 0x59c   :  { %445 = vst.msk [vmem:[#allocation2] sm:$0x1] %vm444_vm2, %v442_v27  ;;  %2858 = vmatmul.mubr.msk.f32.vlgmr.msra.gmra.mrb[4].mxu1 %vm82_vm0, %v442_v27 }
 0x59d   :  { %2873 = vmatprep.mubr.msk.f32.mxu1 %vm3465_vm1, %v3466_v11 }
 0x59f   :  { %v3733_v28 = vpop.permute.xlu1 %641 }
 0x5a0   :  { %2869 = vmatmul.mubr.msk.f32.vlgmr.msra.gmra.mrb[6].mxu0 %vm82_vm0, %v3733_v28 }
 0x5a1   :  { %2883 = vmatprep.mubr.msk.f32.mxu0 %vm3465_vm1, %v3466_v11  ;;  %2882 = vmatpush3.msra.mxu0 %v898_v52 }
 0x5a2   :  { %3090 = vmatprep.subr.bf16.mxu0 %v3464_v2 }
 0x66f   :  { %v635_v29 = vpop.f32.mrb[4].mxu1 }
 0x670   :  { %v2859_v30 = vpop.f32.mrb[5].mxu1 }
 0x673   :  { %v711_v31 = vpop.f32.mrb[6].mxu0 }
 0x674   :  { %v712_v33 = vadd.f32 %v711_v31, %v635_v29  ;;  %v2870_v34 = vpop.f32.mrb[7].mxu0  ;;  %v3097_v29 = vpack.c.bf16 %v1223_v25, %v1222_v24  ;;  %v1224_v31 = vld [vmem:[%s4294_s2 + $0x10] sm:$0xff] }
 0x675   :  { %v1402_v34 = vld [vmem:[%s4250_s11] sm:$0xff] }
 0x676   :  { %v716_v35 = vadd.f32 %v715_v32, %v712_v33  ;;  %v1225_v32 = vld [vmem:[%s4294_s2 + $0x18] sm:$0xff] }
 0x677   :  { %v3100_v33 = vpack.c.bf16 %v1225_v32, %v1224_v31 }
 0x678   :  { %3274 = vtanh.f32 %v716_v35  ;;  %v2650_v37 = vmul.f32 -1.442695, %v716_v35  ;;  %v1403_v35 = vld [vmem:[%s4250_s11 + $0x8] sm:$0xff] }
 0x67a   :  { %3276 = vpow2.f32 %v2650_v37  ;;  %v1404_v37 = vld [vmem:[%s4250_s11 + $0x10] sm:$0xff] }
 0x682   :  { %v3275_v36 = vpop.eup %3274 }
 0x683   :  { %726 = vrot.lane.b32.xlu0 %v3275_v36, %s3467_s30  ;;  %v3109_v36 = vpack.c.bf16 %v1403_v35, %v1402_v34 }
 0x684   :  { %v3277_v38 = vpop.eup %3276 }
 0x685   :  { %v720_v39 = vadd.f32 1.0, %v3277_v38  ;;  %v1405_v38 = vld [vmem:[%s4250_s11 + $0x18] sm:$0xff] }
 0x687   :  { %3278 = vrcp.f32 %v720_v39  ;;  %v3112_v39 = vpack.c.bf16 %v1405_v38, %v1404_v37  ;;  %v1578_v37 = vld [vmem:[%s4258_s19 + $0x8] sm:$0xff]  ;;  %v1579_v38 = vld [vmem:[%s4258_s19 + $0x10] sm:$0xff] }
 0x691   :  { %v3279_v40 = vpop.eup %3278 }
 0x692   :  { %v724_v43 = vmul.f32 %v3279_v40, %v433_v16  ;;  %v1065_v16 = vld [vmem:[%s4255_s16] sm:$0xff] }
 0x6f5   :  { %v727_v41 = vpop.permute.xlu0 %726 }
 0x6f6   :  { %v729_v42 = vmul.f32 %v3279_v40, %v727_v41 }
 0x6f8   :  { %731 = vrot.lane.b32.xlu1 %v729_v42, %s4291_s3  ;;  %v1221_v42 = vld [vmem:[%s4293_s4 + $0x18] sm:$0xff] }
 0x76a   :  { %v732_v44 = vpop.permute.xlu1 %731 }
 0x76b   :  { %v3744_v45 = vadd.f32 %v732_v44, %v724_v43 }
 0x76d   :  { %3280 = vtanh.f32 %v3744_v45 }
 0x777   :  { %v3281_v46 = vpop.eup %3280 }
 0x778   :  { %737 = vrot.lane.b32.xlu0 %v3281_v46, %s3467_s30  ;;  %v1216_v46 = vld [vmem:[%s4257_s18] sm:$0x1] }
 0x7ea   :  { %v738_v47 = vpop.permute.xlu0 %737 }
 0x7eb   :  { %v740_v48 = vmul.f32 %v3279_v40, %v738_v47 }
 0x7ed   :  { %742 = vrot.lane.b32.xlu1 %v740_v48, %s4291_s3 }
 0x85f   :  { %v3749_v49 = vpop.permute.xlu1 %742 }
 0x860   :  { %745 = vst.msk [vmem:[#allocation2 + $0x1] sm:$0x1] %vm444_vm2, %v3749_v49 }
 0x867   :  { %v3753_v50 = vld [vmem:[#allocation2] sm:$0xff] }
 0x868   :  { %2872 = vmatpush3.xpose.msk.msra.mxu1 %vm82_vm0, %v3753_v50 }
 0x869   :  { %2876 = vmatprep.subr.mxu1 %v3466_v11 }
 0x86b   :  { %2874 = vmatmul.mubr.msk.f32.vlgmr.msra.gmra.mrb[6].mxu1 %vm82_vm0, %v3469_v51 }
 0x86c   :  { %2877 = vmatpush3.xpose.msk.msra.mxu1 %vm82_vm0, %v3753_v50  ;;  %2878 = vmatprep.mubr.msk.f32.mxu1 %vm3465_vm1, %v3466_v11 }
 0x86d   :  { %2886 = vmatprep.subr.mxu1 %v3466_v11 }
 0x86f   :  { %2879 = vmatmul.mubr.msk.f32.vlgmr.msra.gmra.mrb[8].mxu1 %vm82_vm0, %v3749_v49 }
 0x870   :  { %2888 = vmatprep.mubr.msk.f32.mxu1 %vm3465_vm1, %v3466_v11  ;;  %2887 = vmatpush3.msra.mxu1 %v991_v57  ;;  %v1369_v57 = vld [vmem:[%s4248_s9] sm:$0x1] }
 0x871   :  { %2902 = vmatprep.subr.mxu1 %v3466_v11 }
 0x873   :  { %2889 = vmatmul.mubr.msk.f32.vlgmr.msra.gmra.mrb[10].mxu1 %vm900_vm3, %v2656_v61 }
 0x874   :  { %2904 = vmatprep.mubr.msk.f32.mxu1 %vm3465_vm1, %v3466_v11  ;;  %2903 = vmatpush3.msra.mxu1 %v1065_v16 }
 0x875   :  { %3096 = vmatprep.subr.bf16.mxu1 %v3464_v2 }
 0x93e   :  { %v3772_v53 = vpop.f32.mrb[6].mxu1 }
 0x93f   :  { %v2875_v54 = vpop.f32.mrb[7].mxu1 }
 0x942   :  { %v894_v55 = vpop.f32.mrb[8].mxu1 }
 0x943   :  { %v2880_v56 = vpop.f32.mrb[9].mxu1  ;;  %2884 = vmatmul.mubr.msk.f32.vlgmr.msra.gmra.mrb[8].mxu0 %vm900_vm3, %v894_v55 }
 0x944   :  { %2899 = vmatprep.mubr.msk.f32.mxu0 %vm3465_vm1, %v3466_v11  ;;  %3092 = vmatpush3.bf16.msra.mxu0 %v3091_v12  ;;  %v1400_v12 = vld [vmem:[%s4249_s10 + $0x10] sm:$0xff] }
 0x945   :  { %3093 = vmatprep.subr.bf16.mxu0 %v3464_v2 }
 0x946   :  { %v1061_v17 = vpop.f32.mrb[10].mxu1 }
 0x947   :  { %v2890_v18 = vpop.f32.mrb[11].mxu1 }
 0x948   :  { %3095 = vmatpush3.bf16.msra.mxu0 %v3094_v15 }
 0x949   :  { %3102 = vmatprep.subr.bf16.mxu0 %v3464_v2 }
 0x94b   :  { %2900 = vmatmul.mubr.msk.f32.vlgmr.msra.gmra.mrb[10].mxu0 %vm82_vm0, %v1061_v17 }
 0x94c   :  { %2926 = vmatprep.mubr.msk.f32.mxu0 %vm3465_vm1, %v3466_v11  ;;  %3104 = vmatpush3.bf16.msra.mxu0 %v3103_v22 }
 0x94d   :  { %3105 = vmatprep.subr.bf16.mxu0 %v3464_v2 }
 0xa16   :  { %v970_v63 = vpop.f32.mrb[8].mxu0 }
 0xa17   :  { %v971_v0 = vadd.f32 %v970_v63, %v899_v62  ;;  %v2885_v1 = vpop.f32.mrb[9].mxu0 }
 0xa19   :  { %v975_v3 = vsel %vm974_vm5, %v971_v0, -inf }
 0xa1a   :  { %976 = vmax.xlane.f32.xlu0 %v975_v3 }
 0xa1e   :  { %v1139_v40 = vpop.f32.mrb[10].mxu0 }
 0xa1f   :  { %v2901_v41 = vpop.f32.mrb[11].mxu0 }
 0xaa7   :  { %v977_v4 = vpop.xlane.xlu0 %976 }
 0xaa8   :  { %v978_v5 = vsub.f32 %v971_v0, %v977_v4 }
 0xaaa   :  { %v979_v6 = vmul.f32 1.442695, %v978_v5  ;;  %v1379_v5 = vrot.slane %v3722_v19, 1  ;;  %v1401_v19 = vld [vmem:[%s4249_s10 + $0x18] sm:$0xff] }
 0xaab   :  { %v3118_v14 = vpack.c.bf16 %v1401_v19, %v1400_v12 }
 0xaac   :  { %3282 = vpow2.f32 %v979_v6 }
 0xab6   :  { %v3283_v7 = vpop.eup %3282 }
 0xab7   :  { %v981_v8 = vsel %vm974_vm5, %v3283_v7, 0.0 }
 0xab8   :  { %982 = vadd.xlane.f32.xlu1 %v981_v8 }
 0xb45   :  { %v983_v23 = vpop.xlane.xlu1 %982 }
 0xb46   :  { %3284 = vrcp.f32 %v983_v23 }
 0xb50   :  { %v3285_v26 = vpop.eup %3284 }
 0xb51   :  { %v985_v27 = vmul.f32 %v3285_v26, %v3283_v7 }
 0xb53   :  { %v986_v30 = vmul.f32 %v985_v27, %v3772_v53 }
 0xb55   :  { %2905 = vmatmul.mubr.msk.f32.vlgmr.msra.gmra.mrb[12].mxu1 %vm900_vm3, %v986_v30 }
 0xb56   :  { %3098 = vmatpush3.bf16.msra.mxu1 %v3097_v29  ;;  %2915 = vmatprep.mubr.msk.f32.mxu1 %vm3465_vm1, %v3466_v11 }
 0xb57   :  { %3099 = vmatprep.subr.bf16.mxu1 %v3464_v2 }
 0xb5a   :  { %3101 = vmatpush3.bf16.msra.mxu1 %v3100_v33 }
 0xb5b   :  { %3108 = vmatprep.subr.bf16.mxu1 %v3464_v2 }
 0xb5d   :  { %2916 = vmatmul.mubr.msk.f32.vlgmr.msra.gmra.mrb[14].mxu1 %vm82_vm0, %v3733_v28  ;;  %v1220_v28 = vld [vmem:[%s4293_s4 + $0x10] sm:$0xff] }
 0xb5e   :  { %3110 = vmatpush3.bf16.msra.mxu1 %v3109_v36  ;;  %2937 = vmatprep.mubr.msk.f32.mxu1 %vm3465_vm1, %v3466_v11  ;;  %v3106_v43 = vpack.c.bf16 %v1221_v42, %v1220_v28  ;;  %v1577_v36 = vld [vmem:[%s4258_s19] sm:$0xff] }
 0xb5f   :  { %3111 = vmatprep.subr.bf16.mxu1 %v3464_v2 }
 0xb60   :  { %3107 = vmatpush3.bf16.msra.mxu0 %v3106_v43 }
 0xb61   :  { %3114 = vmatprep.subr.bf16.mxu0 %v3464_v2 }
 0xb62   :  { %3113 = vmatpush3.bf16.msra.mxu1 %v3112_v39  ;;  %v3121_v39 = vpack.c.bf16 %v1578_v37, %v1577_v36 }
 0xb63   :  { %3120 = vmatprep.subr.bf16.mxu1 %v3464_v2 }
 0xb65   :  { %2938 = vmatmul.mubr.msk.f32.vlgmr.msra.gmra.mrb[16].mxu1 %vm82_vm0, %v3749_v49 }
 0xb66   :  { %2959 = vmatprep.mubr.msk.f32.mxu1 %vm3465_vm1, %v3466_v11  ;;  %3122 = vmatpush3.bf16.msra.mxu1 %v3121_v39 }
 0xb67   :  { %3123 = vmatprep.subr.bf16.mxu1 %v3464_v2 }
 0xc28   :  { %v1212_v44 = vpop.f32.mrb[12].mxu1 }
 0xc29   :  { %v1213_v47 = vadd.f32 %v1212_v44, %v1139_v40  ;;  %v2906_v48 = vpop.f32.mrb[13].mxu1  ;;  %v1581_v44 = vld [vmem:[%s4259_s20] sm:$0x1] }
 0xc2b   :  { %v1217_v49 = vadd.f32 %v1216_v46, %v1213_v47 }
 0xc2d   :  { %2927 = vmatmul.mubr.msk.f32.vlgmr.msra.gmra.mrb[12].mxu0 %vm82_vm0, %v1217_v49 }
 0xc2e   :  { %2948 = vmatprep.mubr.msk.f32.mxu0 %vm3465_vm1, %v3466_v11  ;;  %3116 = vmatpush3.bf16.msra.mxu0 %v3115_v13 }
 0xc2f   :  { %3117 = vmatprep.subr.bf16.mxu0 %v3464_v2 }
 0xc30   :  { %v1292_v51 = vpop.f32.mrb[14].mxu1 }
 0xc31   :  { %v2917_v52 = vpop.f32.mrb[15].mxu1 }
 0xc32   :  { %3119 = vmatpush3.bf16.msra.mxu0 %v3118_v14 }
 0xc38   :  { %v1472_v54 = vpop.f32.mrb[16].mxu1 }
 0xc39   :  { %v2939_v55 = vpop.f32.mrb[17].mxu1 }
 0xd00   :  { %v1365_v56 = vpop.f32.mrb[12].mxu0 }
 0xd01   :  { %v1366_v58 = vadd.f32 %v1365_v56, %v1292_v51  ;;  %v2928_v59 = vpop.f32.mrb[13].mxu0 }
 0xd03   :  { %v1370_v61 = vadd.f32 %v1369_v57, %v1366_v58 }
 0xd05   :  { %3286 = vtanh.f32 %v1370_v61  ;;  %v2662_v63 = vmul.f32 -1.442695, %v1370_v61 }
 0xd07   :  { %3288 = vpow2.f32 %v2662_v63 }
 0xd0f   :  { %v3287_v62 = vpop.eup %3286 }
 0xd10   :  { %1383 = vrot.lane.b32.xlu0 %v3287_v62, %s3467_s30 }
 0xd11   :  { %v3289_v0 = vpop.eup %3288 }
 0xd12   :  { %v1374_v11 = vadd.f32 1.0, %v3289_v0 }
 0xd14   :  { %3290 = vrcp.f32 %v1374_v11 }
 0xd1e   :  { %v3291_v1 = vpop.eup %3290 }
 0xd1f   :  { %v1381_v6 = vmul.f32 %v3291_v1, %v1379_v5 }
 0xd82   :  { %v1384_v3 = vpop.permute.xlu0 %1383 }
 0xd83   :  { %v1386_v4 = vmul.f32 %v3291_v1, %v1384_v3 }
 0xd85   :  { %1388 = vrot.lane.b32.xlu1 %v1386_v4, %s4291_s3  ;;  %v3470_v4 = vmov 0  }
 0xdf7   :  { %v1389_v7 = vpop.permute.xlu1 %1388 }
 0xdf8   :  { %v3883_v8 = vadd.f32 %v1389_v7, %v1381_v6  }
 0xdfa   :  { %3292 = vtanh.f32 %v3883_v8 }
 0xe04   :  { %v3293_v15 = vpop.eup %3292 }
 0xe05   :  { %1394 = vrot.lane.b32.xlu0 %v3293_v15, %s3467_s30 }
 0xe77   :  { %v1395_v16 = vpop.permute.xlu0 %1394 }
 0xe78   :  { %v3900_v17 = vmul.f32 %v3291_v1, %v1395_v16  }
 0xe7a   :  { %1477 = vrot.lane.b32.xlu1 %v3900_v17, %s4291_s3 }
 0xeec   :  { %v1478_v18 = vpop.permute.xlu1 %1477 }
 0xeed   :  { %2949 = vmatmul.mubr.msk.f32.vlgmr.msra.gmra.mrb[14].mxu0 %vm82_vm0, %v1478_v18 }
 0xfc0   :  { %v1547_v20 = vpop.f32.mrb[14].mxu0 }
 0xfc1   :  { %v1548_v22 = vadd.f32 %v1547_v20, %v1472_v54  ;;  %v2950_v23 = vpop.f32.mrb[15].mxu0 }
 0xfc3   :  { %v1552_v24 = vadd.f32 %v1551_v21, %v1548_v22 }
 0xfc5   :  { %3294 = vtanh.f32 %v1552_v24  ;;  %v2665_v26 = vmul.f32 -1.442695, %v1552_v24 }
 0xfc7   :  { %3296 = vpow2.f32 %v2665_v26 }
 0xfcf   :  { %v3295_v25 = vpop.eup %3294 }
 0xfd0   :  { %1562 = vrot.lane.b32.xlu0 %v3295_v25, %s3467_s30 }
 0xfd1   :  { %v3297_v27 = vpop.eup %3296 }
 0xfd2   :  { %v1556_v29 = vadd.f32 1.0, %v3297_v27 }
 0xfd4   :  { %3298 = vrcp.f32 %v1556_v29 }
 0xfde   :  { %v3299_v30 = vpop.eup %3298 }
 0xfdf   :  { %v1560_v33 = vmul.f32 %v3299_v30, %v3744_v45  ;;  %v1580_v45 = vld [vmem:[%s4258_s19 + $0x18] sm:$0xff] }
 0xfe0   :  { %v3124_v40 = vpack.c.bf16 %v1580_v45, %v1579_v38 }
 0xfe2   :  { %3125 = vmatpush3.bf16.msra.mxu1 %v3124_v40 }
0x1042   :  { %v1563_v31 = vpop.permute.xlu0 %1562 }
0x1043   :  { %v1565_v32 = vmul.f32 %v3299_v30, %v1563_v31 }
0x1045   :  { %1567 = vrot.lane.b32.xlu1 %v1565_v32, %s4291_s3 }
0x10b7   :  { %v1568_v34 = vpop.permute.xlu1 %1567 }
0x10b8   :  { %v1570_v35 = vadd.f32 %v1568_v34, %v1560_v33  }
0x10ba   :  { %3300 = vtanh.f32 %v1570_v35 }
0x10c4   :  { %v3301_v41 = vpop.eup %3300 }
0x10c5   :  { %1573 = vrot.lane.b32.xlu0 %v3301_v41, %s3467_s30  ;;  %s3952_s30 = smov 1  }
0x1137   :  { %v1574_v28 = vpop.permute.xlu0 %1573 }
0x1138   :  { %v1576_v42 = vmul.f32 %v3299_v30, %v1574_v28  }
0x113a   :  { %1583 = vrot.lane.b32.xlu1 %v1576_v42, %s4291_s3 }
0x11ac   :  { %v1584_v43 = vpop.permute.xlu1 %1583 }
0x11ad   :  { %2960 = vmatmul.mubr.msk.f32.vlgmr.msra.gmra.mrb[18].mxu1 %vm82_vm0, %v1584_v43 }
0x1280   :  { %v1653_v46 = vpop.f32.mrb[18].mxu1 }
0x1281   :  { %v1654_v47 = vadd.f32 %v1653_v46, %v1581_v44   ;;  %v2961_v48 = vpop.f32.mrb[19].mxu1 }
0x1283   :  { %1679 = vst [vmem:[#allocation6] sm:$0x1] %v1654_v47  ;;  %v1658_v2 = vsel %vm1657_vm6, %v1654_v47, -inf }
0x1284   :  { %1659 = vmax.xlane.f32.xlu0 %v1658_v2 }
0x1311   :  { %v1660_v49 = vpop.xlane.xlu0 %1659 }
0x1312   :  { %vm1661_vm7 = vcmp.ge.f32.partialorder %v1654_v47, %v1660_v49 }
0x1313   :  { %v1662_v51 = vsel %vm1661_vm7, %v3783_v60, 128 }
0x1314   :  { %v1663_v52 = vsel %vm1657_vm6, %v1662_v51, 2147483647 }
0x1315   :  { %v1665_v54 = vshra.s32 %v1663_v52, 16  ;;  %v1664_v56 = vand.u32 65535, %v1663_v52 }
0x1317   :  { %v1667_v55 = vcvt.s32.f32 %v1665_v54  ;;  %v1666_v58 = vcvt.s32.f32 %v1664_v56 }
0x1319   :  { %1668 = vmin.xlane.f32.xlu1 %v1667_v55 }
0x13a6   :  { %v1669_v57 = vpop.xlane.xlu1 %1668 }
0x13a7   :  { %vm1670_vm8 = vcmp.eq.f32.partialorder %v1667_v55, %v1669_v57  ;;  %v1675_v61 = vcvt.f32.s32 %v1669_v57 }
0x13a8   :  { %v1671_v59 = vsel %vm1670_vm8, %v1666_v58, inf }
0x13a9   :  { %1672 = vmin.xlane.f32.xlu0 %v1671_v59  ;;  %v1676_v63 = vshll.u32 %v1675_v61, 16 }
0x1436   :  { %v1673_v62 = vpop.xlane.xlu0 %1672 }
0x1437   :  { %v1674_v0 = vcvt.f32.s32 %v1673_v62 }
0x1439   :  { %v1677_v11 = vadd.s32 %v1676_v63, %v1674_v0 }
0x143b   :  { %v1678_v1 = vadd.s32 1, %v1677_v11  }
0x143d   :  { %v1681_v3 = vsel %vm1680_vm9, %v1678_v1, 0   ;;  %vm1682_vm10 = vcmp.eq.s32.totalorder %v1678_v1, 2 }
0x143e   :  { %v1683_v5 = vsel %vm1682_vm10, 1, %v3470_v4  }
0x143f LB: > { %v3471_v6 = vmov 0.0   ;;  %vm3472_vm11 = vmmov 0   ;;  %s3473_s3 = smov 32   ;;  %v1774_v7 = vld [vmem:[%s4252_s13] sm:$0xff]  ;;  %vm1861_vm12 = vcmp.eq.s32.totalorder %v3783_v60, %v3442_v1  ;;  %v1940_v27 = vld [vmem:[%s4256_s17 + $0x8] sm:$0xff]  ;;  %v1941_v29 = vld [vmem:[%s4256_s17 + $0x10] sm:$0xff]  ;;  %s3462_s30 = sphi %s3952_s30, %s1689_s30   ;;  %v3458_v17 = vphi %v3900_v17, %v4131_v17   ;;  %v3454_v8 = vphi %v3883_v8, %v4112_v8   ;;  %v3450_v42 = vphi %v1576_v42, %v2562_v42   ;;  %v3446_v35 = vphi %v1570_v35, %v2563_v35   ;;  %v3442_v1 = vphi %v1678_v1, %v2564_v1   ;;  %v3438_v5 = vphi %v1683_v5, %v2568_v5   ;;  %v3434_v3 = vphi %v1681_v3, %v4298_v3   ;;  %v3430_v47 = vphi %v1654_v47, %v4297_v47  }
0x1440   : > { %2962 = vmatprep.subr.mxu0 %v3471_v6  ;;  %2964 = vmatprep.mubr.msk.f32.mxu0 %vm3472_vm11, %v3471_v6  ;;  %v1864_v13 = vld [vmem:[%s4254_s15] sm:$0xff]  ;;  %v2670_v19 = vsel %vm1861_vm12, 1.0, %v3471_v6  ;;  %v3474_v31 = vmov 0.0|0.0   ;;  %v1942_v33 = vld [vmem:[%s4256_s17 + $0x18] sm:$0xff]  ;;  %s4295_s1 = sld [smem:[#allocation18_spill]]  ;;  %s4296_s21 = sld [smem:[#allocation19_spill]] }
0x1441   : > { %1700 = vrot.lane.b32.xlu0 %v3450_v42, %s3473_s3  ;;  %2963 = vmatpush3.xpose.msk.msra.mxu0 %vm82_vm0, %v3753_v50  ;;  %v1775_v14 = vld [vmem:[%s4253_s14] sm:$0x1]  ;;  %v3130_v37 = vpack.c.bf16 %v1942_v33, %v1941_v29  ;;  %v2278_v54 = vld [vmem:[%s4250_s11 + $0x8] sm:$0xff]  ;;  %v2279_v57 = vld [vmem:[%s4250_s11 + $0x10] sm:$0xff]  ;;  %s3475_s5 = smov 64   ;;  %vm1698_vm13 = vcmp.eq.s32.totalorder %v3438_v5, 0 }
0x1442   : > { %2967 = vmatprep.subr.mxu0 %v3471_v6  ;;  %2972 = vmatprep.subr.mxu1 %v3471_v6  ;;  %v1939_v26 = vld [vmem:[%s4256_s17] sm:$0xff]  ;;  %v2280_v58 = vld [vmem:[%s4250_s11 + $0x18] sm:$0xff] }
0x1443   : > { %2974 = vmatprep.mubr.msk.f32.mxu1 %vm3472_vm11, %v3471_v6  ;;  %2973 = vmatpush3.msra.mxu1 %v1864_v13  ;;  %v3127_v32 = vpack.c.bf16 %v1940_v27, %v1939_v26  ;;  %v1938_v34 = vld [vmem:[%s4255_s16] sm:$0xff]  ;;  %v3148_v59 = vpack.c.bf16 %v2280_v58, %v2279_v57 }
0x1444   : > { %2988 = vmatprep.subr.mxu1 %v3471_v6  ;;  %2975 = vmatmul.mubr.msk.f32.vlgmr.msra.gmra.mrb[0].mxu1 %vm900_vm3, %v2670_v19  ;;  %v2277_v52 = vld [vmem:[%s4250_s11] sm:$0xff] }
0x1445   : > { %2990 = vmatprep.mubr.msk.f32.mxu1 %vm3472_vm11, %v3471_v6  ;;  %2989 = vmatpush3.msra.mxu1 %v1938_v34  ;;  %v3145_v56 = vpack.c.bf16 %v2278_v54, %v2277_v52  ;;  %v2273_v34 = vld [vmem:[%s4249_s10] sm:$0xff] }
0x1446   : > { %3132 = vmatprep.subr.bf16.mxu1 %v3474_v31  ;;  %v2091_v38 = vld [vmem:[%s4295_s1] sm:$0xff]  ;;  %v2092_v39 = vld [vmem:[%s4295_s1 + $0x8] sm:$0xff]  ;;  %v2097_v2 = vld [vmem:[%s4296_s21 + $0x10] sm:$0xff] }
0x1447   : > { %v3139_v45 = vpack.c.bf16 %v2092_v39, %v2091_v38  ;;  %v2095_v41 = vld [vmem:[%s4296_s21] sm:$0xff]  ;;  %v2096_v28 = vld [vmem:[%s4296_s21 + $0x8] sm:$0xff]  ;;  %v2098_v49 = vld [vmem:[%s4296_s21 + $0x18] sm:$0xff] }
0x1448   : > { %v3133_v46 = vpack.c.bf16 %v2096_v28, %v2095_v41  ;;  %v3136_v51 = vpack.c.bf16 %v2098_v49, %v2097_v2  ;;  %v2093_v63 = vld [vmem:[%s4295_s1 + $0x10] sm:$0xff]  ;;  %v2094_v0 = vld [vmem:[%s4295_s1 + $0x18] sm:$0xff] }
0x1449   : > { %v3142_v11 = vpack.c.bf16 %v2094_v0, %v2093_v63  ;;  %v2276_v39 = vld [vmem:[%s4249_s10 + $0x18] sm:$0xff]  ;;  %v2452_v63 = vld [vmem:[%s4258_s19] sm:$0xff]  ;;  %v2453_v0 = vld [vmem:[%s4258_s19 + $0x8] sm:$0xff] }
0x14b3   : > { %v3995_v9 = vpop.permute.xlu0 %1700 }
0x14b4   : > { %2965 = vmatmul.mubr.msk.f32.vlgmr.msra.gmra.mrb[0].mxu0 %vm82_vm0, %v3995_v9 }
0x14b5   : > { %2968 = vmatpush3.msra.mxu0 %v1774_v7  ;;  %2969 = vmatprep.mubr.msk.f32.mxu0 %vm3472_vm11, %v3471_v6  ;;  %v2089_v7 = vld [vmem:[%s4257_s18] sm:$0x1] }
0x14b6   : > { %3126 = vmatprep.subr.bf16.mxu0 %v3474_v31 }
0x1517   : > { %v1934_v30 = vpop.f32.mrb[0].mxu1 }
0x1518   : > { %v2976_v36 = vpop.f32.mrb[1].mxu1 }
0x1519   : > { %v2274_v36 = vld [vmem:[%s4249_s10 + $0x8] sm:$0xff] }
0x151a   : > { %v3151_v38 = vpack.c.bf16 %v2274_v36, %v2273_v34 }
0x1587   : > { %v1770_v10 = vpop.f32.mrb[0].mxu0 }
0x1588   : > { %v2966_v12 = vpop.f32.mrb[1].mxu0  ;;  %2970 = vmatmul.mubr.msk.f32.vlgmr.msra.gmra.mrb[2].mxu0 %vm900_vm3, %v1770_v10 }
0x1589   : > { %2985 = vmatprep.mubr.msk.f32.mxu0 %vm3472_vm11, %v3471_v6  ;;  %3128 = vmatpush3.bf16.msra.mxu0 %v3127_v32 }
0x158a   : > { %3129 = vmatprep.subr.bf16.mxu0 %v3474_v31 }
0x158d   : > { %3131 = vmatpush3.bf16.msra.mxu0 %v3130_v37  ;;  %v2275_v37 = vld [vmem:[%s4249_s10 + $0x10] sm:$0xff] }
0x158e   : > { %3138 = vmatprep.subr.bf16.mxu0 %v3474_v31 }
0x1590   : > { %2986 = vmatmul.mubr.msk.f32.vlgmr.msra.gmra.mrb[4].mxu0 %vm82_vm0, %v1934_v30 }
0x1591   : > { %3012 = vmatprep.mubr.msk.f32.mxu0 %vm3472_vm11, %v3471_v6  ;;  %3140 = vmatpush3.bf16.msra.mxu0 %v3139_v45  ;;  %v3154_v45 = vpack.c.bf16 %v2276_v39, %v2275_v37  ;;  %v3476_v39 = vmov 0  }
0x1592   : > { %3141 = vmatprep.subr.bf16.mxu0 %v3474_v31 }
0x1595   : > { %3143 = vmatpush3.bf16.msra.mxu0 %v3142_v11  ;;  %v2454_v11 = vld [vmem:[%s4258_s19 + $0x10] sm:$0xff] }
0x1596   : > { %3150 = vmatprep.subr.bf16.mxu0 %v3474_v31 }
0x165b   : > { %v1845_v15 = vpop.f32.mrb[2].mxu0 }
0x165c   : > { %v1846_v16 = vadd.f32 %v1845_v15, %v1775_v14  ;;  %v2971_v18 = vpop.f32.mrb[3].mxu0 }
0x165d   : > { %v2247_v18 = vld [vmem:[%s4248_s9] sm:$0x1] }
0x165e   : > { %v1849_v20 = vsel %vm974_vm5, %v1846_v16, -inf }
0x165f   : > { %1850 = vmax.xlane.f32.xlu0 %v1849_v20 }
0x1663   : > { %v2012_v61 = vpop.f32.mrb[4].mxu0 }
0x1664   : > { %v2987_v62 = vpop.f32.mrb[5].mxu0 }
0x16ec   : > { %v1851_v21 = vpop.xlane.xlu0 %1850 }
0x16ed   : > { %v1852_v22 = vsub.f32 %v1846_v16, %v1851_v21 }
0x16ef   : > { %v1853_v23 = vmul.f32 1.442695, %v1852_v22 }
0x16f1   : > { %3302 = vpow2.f32 %v1853_v23 }
0x16fb   : > { %v3303_v24 = vpop.eup %3302 }
0x16fc   : > { %v1855_v25 = vsel %vm974_vm5, %v3303_v24, 0.0 }
0x16fd   : > { %1856 = vadd.xlane.f32.xlu1 %v1855_v25 }
0x170e   : > { %2100 = vrot.lane.b32.xlu1 %v3458_v17, %s3473_s3 }
0x178a   : > { %v1857_v40 = vpop.xlane.xlu1 %1856 }
0x178b   : > { %3304 = vrcp.f32 %v1857_v40 }
0x178e   : > { %v2101_v55 = vpop.permute.xlu1 %2100 }
0x1795   : > { %v3305_v43 = vpop.eup %3304 }
0x1796   : > { %v1859_v44 = vmul.f32 %v3305_v43, %v3303_v24 }
0x1798   : > { %v1860_v48 = vmul.f32 %v1859_v44, %v3772_v53 }
0x179a   : > { %2991 = vmatmul.mubr.msk.f32.vlgmr.msra.gmra.mrb[2].mxu1 %vm900_vm3, %v1860_v48 }
0x179b   : > { %3134 = vmatpush3.bf16.msra.mxu1 %v3133_v46  ;;  %3001 = vmatprep.mubr.msk.f32.mxu1 %vm3472_vm11, %v3471_v6  ;;  %v2426_v46 = vld [vmem:[%s4251_s12] sm:$0x1] }
0x179c   : > { %3135 = vmatprep.subr.bf16.mxu1 %v3474_v31 }
0x179f   : > { %3137 = vmatpush3.bf16.msra.mxu1 %v3136_v51 }
0x17a0   : > { %3144 = vmatprep.subr.bf16.mxu1 %v3474_v31 }
0x17a2   : > { %3002 = vmatmul.mubr.msk.f32.vlgmr.msra.gmra.mrb[4].mxu1 %vm82_vm0, %v2101_v55 }
0x17a3   : > { %3146 = vmatpush3.bf16.msra.mxu1 %v3145_v56  ;;  %3023 = vmatprep.mubr.msk.f32.mxu1 %vm3472_vm11, %v3471_v6 }
0x17a4   : > { %3147 = vmatprep.subr.bf16.mxu1 %v3474_v31 }
0x17a7   : > { %3149 = vmatpush3.bf16.msra.mxu1 %v3148_v59 }
0x17a8   : > { %3156 = vmatprep.subr.bf16.mxu1 %v3474_v31 }
0x17aa   : > { %3024 = vmatmul.mubr.msk.f32.vlgmr.msra.gmra.mrb[6].mxu1 %vm82_vm0, %v3995_v9 }
0x17ab   : > { %3045 = vmatprep.mubr.msk.f32.mxu1 %vm3472_vm11, %v3471_v6 }
0x186d   : > { %v2085_v4 = vpop.f32.mrb[2].mxu1 }
0x186e   : > { %v2086_v9 = vadd.f32 %v2085_v4, %v2012_v61  ;;  %v2992_v10 = vpop.f32.mrb[3].mxu1  ;;  %v3157_v4 = vpack.c.bf16 %v2453_v0, %v2452_v63 }
0x1870   : > { %v2090_v12 = vadd.f32 %v2089_v7, %v2086_v9  ;;  %v2455_v7 = vld [vmem:[%s4258_s19 + $0x18] sm:$0xff]  ;;  %3158 = vmatpush3.bf16.msra.mxu1 %v3157_v4 }
0x1871   : > { %v3160_v9 = vpack.c.bf16 %v2455_v7, %v2454_v11  ;;  %3159 = vmatprep.subr.bf16.mxu1 %v3474_v31 }
0x1872   : > { %3013 = vmatmul.mubr.msk.f32.vlgmr.msra.gmra.mrb[6].mxu0 %vm82_vm0, %v2090_v12 }
0x1873   : > { %3034 = vmatprep.mubr.msk.f32.mxu0 %vm3472_vm11, %v3471_v6  ;;  %3152 = vmatpush3.bf16.msra.mxu0 %v3151_v38 }
0x1874   : > { %3153 = vmatprep.subr.bf16.mxu0 %v3474_v31  ;;  %3161 = vmatpush3.bf16.msra.mxu1 %v3160_v9 }
0x1875   : > { %v2170_v13 = vpop.f32.mrb[4].mxu1 }
0x1876   : > { %v3003_v19 = vpop.f32.mrb[5].mxu1 }
0x1877   : > { %3155 = vmatpush3.bf16.msra.mxu0 %v3154_v45 }
0x187d   : > { %v2347_v14 = vpop.f32.mrb[6].mxu1 }
0x187e   : > { %v3025_v15 = vpop.f32.mrb[7].mxu1 }
0x1945   : > { %v2243_v16 = vpop.f32.mrb[6].mxu0 }
0x1946   : > { %v2244_v20 = vadd.f32 %v2243_v16, %v2170_v13  ;;  %v3014_v21 = vpop.f32.mrb[7].mxu0 }
0x1948   : > { %v2248_v22 = vadd.f32 %v2247_v18, %v2244_v20 }
0x194a   : > { %3306 = vtanh.f32 %v2248_v22  ;;  %v2676_v24 = vmul.f32 -1.442695, %v2248_v22 }
0x194c   : > { %3308 = vpow2.f32 %v2676_v24 }
0x1954   : > { %v3307_v23 = vpop.eup %3306 }
0x1955   : > { %2258 = vrot.lane.b32.xlu1 %v3307_v23, %s3475_s5 }
0x1956   : > { %v3309_v6 = vpop.eup %3308 }
0x1957   : > { %v2252_v25 = vadd.f32 1.0, %v3309_v6 }
0x1959   : > { %3310 = vrcp.f32 %v2252_v25 }
0x1963   : > { %v3311_v26 = vpop.eup %3310 }
0x1964   : > { %v2256_v30 = vmul.f32 %v3454_v8, %v3311_v26 }
0x19c7   : > { %v2259_v27 = vpop.permute.xlu1 %2258 }
0x19c8   : > { %v2261_v29 = vmul.f32 %v3311_v26, %v2259_v27 }
0x19ca   : > { %2263 = vrot.lane.b32.xlu1 %v2261_v29, %s3473_s3 }
0x1a3c   : > { %v2264_v32 = vpop.permute.xlu1 %2263 }
0x1a3d   : > { %v2266_v33 = vadd.f32 %v2264_v32, %v2256_v30  ;;  %v2553_v30 = vstv %s3462_s30  ;;  %s1689_s30 = sadd.s32 1, %s3462_s30  }
0x1a3e   : > { %vm2554_vm1 = vcmp.eq.s32.totalorder %v3783_v60, %v2553_v30  ;;  %p1686_p0 = scmp.ge.s32.totalorder %s1689_s30, 8  }
0x1a3f   : > { %3312 = vtanh.f32 %v2266_v33  ;;  %v4112_v8 = vsel %vm1698_vm13, %v2266_v33, %v3454_v8   ;;  %vm2557_vm2 = vmand %vm2554_vm1, %vm1698_vm13  ;;  %s3478_s7 = smov (%p1686_p0), [#allocation4]  }
0x1a40   :  { %s2577_s29 = sshll.u32 (%p1686_p0), %s3478_s7, 4  ;;  %s2578_s29 = int_to_ptr.vmem [resolvable:$true] %s2577_s29 }
0x1a49   : > { %v3313_v40 = vpop.eup %3312 }
0x1a4a   : > { %2269 = vrot.lane.b32.xlu1 %v3313_v40, %s3475_s5 }
0x1abc   : > { %v2270_v41 = vpop.permute.xlu1 %2269 }
0x1abd   : > { %v2272_v28 = vmul.f32 %v3311_v26, %v2270_v41 }
0x1abf   : > { %v4131_v17 = vsel %vm1698_vm13, %v2272_v28, %v3458_v17   ;;  %2352 = vrot.lane.b32.xlu1 %v2272_v28, %s3473_s3 }
0x1b31   : > { %v2353_v43 = vpop.permute.xlu1 %2352 }
0x1b32   : > { %3035 = vmatmul.mubr.msk.f32.vlgmr.msra.gmra.mrb[8].mxu0 %vm82_vm0, %v2353_v43 }
0x1c05   : > { %v2422_v44 = vpop.f32.mrb[8].mxu0 }
0x1c06   : > { %v2423_v48 = vadd.f32 %v2422_v44, %v2347_v14  ;;  %v3036_v2 = vpop.f32.mrb[9].mxu0  ;;  %v2456_v14 = vld [vmem:[%s4259_s20] sm:$0x1] }
0x1c08   : > { %v2427_v49 = vadd.f32 %v2426_v46, %v2423_v48 }
0x1c0a   : > { %3314 = vtanh.f32 %v2427_v49  ;;  %v2679_v52 = vmul.f32 -1.442695, %v2427_v49 }
0x1c0c   : > { %3316 = vpow2.f32 %v2679_v52 }
0x1c14   : > { %v3315_v51 = vpop.eup %3314 }
0x1c15   : > { %2437 = vrot.lane.b32.xlu0 %v3315_v51, %s3475_s5 }
0x1c16   : > { %v3317_v54 = vpop.eup %3316 }
0x1c17   : > { %v2431_v55 = vadd.f32 1.0, %v3317_v54 }
0x1c19   : > { %3318 = vrcp.f32 %v2431_v55 }
0x1c23   : > { %v3319_v56 = vpop.eup %3318 }
0x1c24   : > { %v2435_v59 = vmul.f32 %v3446_v35, %v3319_v56 }
0x1c87   : > { %v2438_v57 = vpop.permute.xlu0 %2437 }
0x1c88   : > { %v2440_v58 = vmul.f32 %v3319_v56, %v2438_v57 }
0x1c8a   : > { %2442 = vrot.lane.b32.xlu1 %v2440_v58, %s3473_s3 }
0x1cfc   : > { %v2443_v61 = vpop.permute.xlu1 %2442 }
0x1cfd   : > { %v2445_v62 = vadd.f32 %v2443_v61, %v2435_v59 }
0x1cff   : > { %3320 = vtanh.f32 %v2445_v62  ;;  %v2563_v35 = vsel %vm1698_vm13, %v2445_v62, %v3446_v35  }
0x1d09   : > { %v3321_v10 = vpop.eup %3320 }
0x1d0a   : > { %2448 = vrot.lane.b32.xlu1 %v3321_v10, %s3475_s5 }
0x1d7c   : > { %v2449_v12 = vpop.permute.xlu1 %2448 }
0x1d7d   : > { %v2451_v13 = vmul.f32 %v3319_v56, %v2449_v12 }
0x1d7f   : > { %v2562_v42 = vsel %vm1698_vm13, %v2451_v13, %v3450_v42   ;;  %2458 = vrot.lane.b32.xlu1 %v2451_v13, %s3473_s3  ;;  %s3477_s3 = smov (%p1686_p0), [#allocation6]  }
0x1d80   :  { %s2587_s5 = sshll.u32 (%p1686_p0), %s3477_s3, 4  ;;  %s2588_s5 = int_to_ptr.vmem [resolvable:$true] %s2587_s5 }
0x1d81   :  { %s3322_s0 = scalar_lea.vmem (%p1686_p0), %s2588_s5, 16  ;;  %s3326_s25 = scalar_lea.vmem (%p1686_p0), %s2588_s5, 32 }
0x1d82   :  { %p3323_p1 = scmp.ne.s32.totalorder (%p1686_p0), %s2588_s5, %s3322_s0  ;;  %p3327_p2 = scmp.lt.s32.totalorder (%p1686_p0), %s2588_s5, %s2588_s5 }
0x1d83   :  { %p3328_p3 = scmp.lt.s32.totalorder (%p1686_p0), %s3326_s25, %s3322_s0 }
0x1d85   :  { %p3329_p4 = por (%p1686_p0), %p3328_p3, %p3327_p2 }
0x1d87   :  { %p3330_p5 = pnand (%p1686_p0), %p3329_p4, %p3323_p1 }
0x1df1   : > { %v2459_v19 = vpop.permute.xlu1 %2458 }
0x1df2   : > { %3046 = vmatmul.mubr.msk.f32.vlgmr.msra.gmra.mrb[8].mxu1 %vm82_vm0, %v2459_v19 }
0x1ec5   : > { %v2528_v31 = vpop.f32.mrb[8].mxu1 }
0x1ec6   : > { %v2529_v15 = vadd.f32 %v2528_v31, %v2456_v14  ;;  %v3047_v16 = vpop.f32.mrb[9].mxu1 }
0x1ec8   : > { %v2559_v18 = vsel %vm1698_vm13, %v2529_v15, %v3430_v47   ;;  %v2532_v20 = vsel %vm1657_vm6, %v2529_v15, -inf }
0x1ec9   : > { %2533 = vmax.xlane.f32.xlu1 %v2532_v20  ;;  %2570 = vst [vmem:[#allocation8] sm:$0x1] (%p1686_p0), %v2559_v18 }
0x1f56   : > { %v2534_v21 = vpop.xlane.xlu1 %2533 }
0x1f57   : > { %vm2535_vm14 = vcmp.ge.f32.partialorder %v2529_v15, %v2534_v21 }
0x1f58   : > { %v2536_v22 = vsel %vm2535_vm14, %v3783_v60, 128 }
0x1f59   : > { %v2537_v23 = vsel %vm1657_vm6, %v2536_v22, 2147483647 }
0x1f5a   : > { %v2539_v24 = vshra.s32 %v2537_v23, 16  ;;  %v2538_v25 = vand.u32 65535, %v2537_v23 }
0x1f5c   : > { %v2541_v6 = vcvt.s32.f32 %v2539_v24  ;;  %v2540_v27 = vcvt.s32.f32 %v2538_v25 }
0x1f5e   : > { %2542 = vmin.xlane.f32.xlu0 %v2541_v6 }
0x1feb   : > { %v2543_v26 = vpop.xlane.xlu0 %2542 }
0x1fec   : > { %vm2544_vm15 = vcmp.eq.f32.partialorder %v2541_v6, %v2543_v26  ;;  %v2549_v47 = vcvt.f32.s32 %v2543_v26 }
0x1fed   : > { %v2545_v29 = vsel %vm2544_vm15, %v2540_v27, inf }
0x1fee   : > { %2546 = vmin.xlane.f32.xlu1 %v2545_v29  ;;  %v2550_v33 = vshll.u32 %v2549_v47, 16  ;;  %v4297_v47 = vmov %v2559_v18 }
0x207b   : > { %v2547_v32 = vpop.xlane.xlu1 %2546 }
0x207c   : > { %v2548_v34 = vcvt.f32.s32 %v2547_v32 }
0x207e   : > { %v2551_v36 = vadd.s32 %v2550_v33, %v2548_v34 }
0x207f   :  { %1688 = sbr.rel (!%p1686_p0) target bundleno = 5183 (0x143f), region = 131 }
0x2080   : > { %v2552_v37 = vadd.s32 1, %v2551_v36 }
0x2082   : > { %v2558_v38 = vsel %vm2557_vm2, %v2552_v37, %v3434_v3   ;;  %v2564_v1 = vsel %vm1698_vm13, %v2552_v37, %v3442_v1   ;;  %vm2565_vm4 = vcmp.eq.s32.totalorder %v2552_v37, 2 }
0x2083   : > { %v2566_v45 = vsel %vm2565_vm4, 1, %v3476_v39  ;;  %v4298_v3 = vmov %v2558_v38  ;;  %2569 = vst [vmem:[#allocation4] sm:$0x1] (%p1686_p0), %v2558_v38 }
0x2084   : > { %vm2567_vm7 = vcmp.gt.s32.totalorder %v3438_v5, %v2566_v45 }
0x2085   : > { %v2568_v5 = vsel %vm2567_vm7, %v3438_v5, %v2566_v45  }
0x2086   :  { %3333 = shalt.err (!%p3330_p5)
}
0x2087   :  { %s3334_s30 = scalar_lea.hbm %s4262_s23, 16 }
0x2088   :  { %p3335_p6 = scmp.ne.s32.totalorder %s4262_s23, %s3334_s30  ;;  %p3338_p7 = scmp.lt.u32.totalorder %s3334_s30, %s4262_s23 }
0x208a   :  { %p3340_p8 = pnand %p3338_p7, %p3335_p6 }
0x208c   :  { %3343 = shalt.err (!%p3340_p8)
}
0x208d   :  { %2590 = dma.vmem_to_hbm [thread:$0]  %s2588_s5, 16, %s4262_s23, [#allocation7]  }
0x208e   :  { %s3344_s15 = scalar_lea.vmem %s2578_s29, 16  ;;  %s3348_s16 = scalar_lea.vmem %s2578_s29, 32 }
0x208f   :  { %p3345_p9 = scmp.ne.s32.totalorder %s2578_s29, %s3344_s15  ;;  %p3349_p10 = scmp.lt.s32.totalorder %s2578_s29, %s2578_s29 }
0x2090   :  { %p3350_p11 = scmp.lt.s32.totalorder %s3348_s16, %s3344_s15 }
0x2092   :  { %p3351_p12 = por %p3350_p11, %p3349_p10 }
0x2094   :  { %p3352_p13 = pnand %p3351_p12, %p3345_p9 }
0x2096   :  { %3355 = shalt.err (!%p3352_p13)
}
0x2097   :  { %s3356_s19 = scalar_lea.hbm %s4261_s22, 16 }
0x2098   :  { %p3357_p0 = scmp.ne.s32.totalorder %s4261_s22, %s3356_s19  ;;  %p3360_p1 = scmp.lt.u32.totalorder %s3356_s19, %s4261_s22 }
0x209a   :  { %p3362_p2 = pnand %p3360_p1, %p3357_p0 }
0x209c   :  { %3365 = shalt.err (!%p3362_p2)
}
0x209d   :  { %2580 = dma.vmem_to_hbm [thread:$0]  %s2578_s29, 16, %s4261_s22, [#allocation5]  }
0x209e   :  { %s3479_s27 = smov [#allocation8]  }
0x209f   :  { %s2597_s6 = sshll.u32 %s3479_s27, 4  ;;  %s2598_s6 = int_to_ptr.vmem [resolvable:$true] %s2597_s6 }
0x20a0   :  { %s3366_s2 = scalar_lea.vmem %s2598_s6, 16  ;;  %s3370_s3 = scalar_lea.vmem %s2598_s6, 32 }
0x20a1   :  { %p3367_p3 = scmp.ne.s32.totalorder %s2598_s6, %s3366_s2  ;;  %p3371_p4 = scmp.lt.s32.totalorder %s2598_s6, %s2598_s6 }
0x20a2   :  { %p3372_p5 = scmp.lt.s32.totalorder %s3370_s3, %s3366_s2 }
0x20a4   :  { %p3373_p6 = por %p3372_p5, %p3371_p4 }
0x20a6   :  { %p3374_p7 = pnand %p3373_p6, %p3367_p3 }
0x20a8   :  { %3377 = shalt.err (!%p3374_p7)
}
0x20a9   :  { %s3378_s0 = scalar_lea.hbm %s4263_s24, 16 }
0x20aa   :  { %p3379_p8 = scmp.ne.s32.totalorder %s4263_s24, %s3378_s0  ;;  %p3382_p9 = scmp.lt.u32.totalorder %s3378_s0, %s4263_s24 }
0x20ac   :  { %p3384_p10 = pnand %p3382_p9, %p3379_p8 }
0x20ae   :  { %3387 = shalt.err (!%p3384_p10)
}
0x20af   :  { %2600 = dma.vmem_to_hbm [thread:$0]  %s2598_s6, 16, %s4263_s24, [#allocation7]  }
0x20b0   :  { %3424 = dma.done.wait [#allocation5], 16  }
0x20b1   :  { %3425 = vsyncadd [#allocation5], 4294967280 }
0x20b2   :  { %3426 = dma.done.wait [#allocation7], 32  }
0x20b3   :  { %3427 = vsyncadd [#allocation7], 4294967264 }
0x20b4   :  { %2610 = vsyncpa [#allocation5], 1 }
0x20b5   :  { %2611 = vsyncpa [#allocation7], 1 }

</bundles_post_ra>
